<compile_context>
chip_gen: v5e
topology: v5e:2x2
jax: 0.10.0
libtpu: 0.0.40
codegen_flags: <defaults>
</compile_context>

<pallas_src>
import jax
import jax.numpy as jnp
from jax.experimental import pallas as pl
from jax.experimental.pallas import tpu as pltpu

K_IN = 28 * 28          # 784 (flattened image)
HID = 512
N_OUT = 10

TILE_B_MAX = 1024       # max batch rows per grid step (sweep 512/1024)
TILE_B_SPLIT = 256      # only split into >=2 tiles if each tile keeps >= this many rows


def _round_up(n, m):
    return ((n + m - 1) // m) * m


def mlp_kernel(x_ref, w1_ref, b1_ref, w2_ref, b2_ref, w3_ref, b3_ref, o_ref):
    # x arrives as f32; cast to bf16 in VMEM (VPU) so all three matmuls hit the
    # bf16 MXU path with f32 accumulation. Weights/biases are VMEM-resident.
    x = x_ref[...].astype(jnp.bfloat16)                                # (tile_b, 784)
    h1 = jnp.dot(x, w1_ref[...], preferred_element_type=jnp.float32) + b1_ref[...]
    h1 = jnp.maximum(h1, 0.0).astype(jnp.bfloat16)                     # (tile_b, 512)
    h2 = jnp.dot(h1, w2_ref[...], preferred_element_type=jnp.float32) + b2_ref[...]
    h2 = jnp.maximum(h2, 0.0).astype(jnp.bfloat16)                     # (tile_b, 512)
    logits = jnp.dot(h2, w3_ref[...], preferred_element_type=jnp.float32) + b3_ref[...]
    o_ref[...] = logits.astype(o_ref.dtype)                            # (tile_b, 10) f32


@jax.jit
def neural_network_forward(x, params):
    """x: (B, 28, 28) float32. Returns logits (B, 10) float32."""
    w1, b1, w2, b2, w3, b3 = params                 # w*: bf16, b*: f32
    B = x.shape[0]
    x_flat = x.reshape(B, K_IN)                     # nn.Flatten(): free metadata op

    # Tile-size selection (trace-time Python; B is static under jit):
    #  - amortize per-step overhead with big tiles,
    #  - keep >=2 (even) grid steps when the batch allows, so v7x's two
    #    TensorCores both get work via dimension_semantics=("parallel",).
    b8 = _round_up(B, 8)
    if b8 >= 2 * TILE_B_SPLIT:
        n_tiles = max(2, pl.cdiv(b8, TILE_B_MAX))
        if n_tiles % 2:
            n_tiles += 1
        tile_b = min(TILE_B_MAX, _round_up(pl.cdiv(b8, n_tiles), 8))
    else:
        tile_b = b8
    B_pad = _round_up(b8, tile_b)
    if B_pad != B:
        x_flat = jnp.pad(x_flat, ((0, B_pad - B), (0, 0)))

    grid = (B_pad // tile_b,)
    # Constant index_map -> weights/biases DMA'd once and stay VMEM-resident.
    resident = lambda shape: pl.BlockSpec(shape, lambda i: tuple(0 for _ in shape))

    out = pl.pallas_call(
        mlp_kernel,
        out_shape=jax.ShapeDtypeStruct((B_pad, N_OUT), jnp.float32),
        grid=grid,
        in_specs=[
            pl.BlockSpec((tile_b, K_IN), lambda i: (i, 0)),   # x: tiled over batch, f32
            resident(w1.shape), resident(b1.shape),
            resident(w2.shape), resident(b2.shape),
            resident(w3.shape), resident(b3.shape),
        ],
        out_specs=pl.BlockSpec((tile_b, N_OUT), lambda i: (i, 0)),
        compiler_params=pltpu.CompilerParams(
            dimension_semantics=("parallel",),                # shard batch tiles across TCs
        ),
    )(x_flat, w1, b1, w2, b2, w3, b3)

    return out[:B]


def init_params(key):
    """PyTorch-style uniform(+/- 1/sqrt(fan_in)) init.
    Weights stored transposed (in_features, out_features), bf16 (MXU-friendly,
    VMEM-resident); biases stay f32."""
    dims = [(K_IN, HID), (HID, HID), (HID, N_OUT)]
    params = []
    for i, (fan_in, fan_out) in enumerate(dims):
        kw, kb = jax.random.split(jax.random.fold_in(key, i))
        bound = 1.0 / (fan_in ** 0.5)
        w = jax.random.uniform(kw, (fan_in, fan_out), jnp.float32, -bound, bound)
        b = jax.random.uniform(kb, (1, fan_out), jnp.float32, -bound, bound)
        params += [w.astype(jnp.bfloat16), b]
    return tuple(params)


def reference_forward(x, params):
    """Pure-JAX reference mirroring the kernel's mixed precision (bf16 in, f32 acc)."""
    w1, b1, w2, b2, w3, b3 = params
    h = x.reshape(x.shape[0], -1).astype(jnp.bfloat16)
    h = jnp.maximum(jnp.dot(h, w1, preferred_element_type=jnp.float32) + b1, 0.0)
    h = h.astype(jnp.bfloat16)
    h = jnp.maximum(jnp.dot(h, w2, preferred_element_type=jnp.float32) + b2, 0.0)
    h = h.astype(jnp.bfloat16)
    return jnp.dot(h, w3, preferred_element_type=jnp.float32) + b3


if __name__ == "__main__":
    key = jax.random.PRNGKey(0)
    params = init_params(jax.random.fold_in(key, 100))
    x = jax.random.normal(jax.random.fold_in(key, 200), (8, 28, 28), jnp.float32)

    logits = jax.block_until_ready(neural_network_forward(x, params))
    ref = reference_forward(x, params)

    assert logits.shape == (8, N_OUT), logits.shape
    # bf16 weights/activations with f32 accumulation: allow bf16-level tolerance.
    assert jnp.allclose(logits, ref, atol=1e-2, rtol=1e-2), \
        float(jnp.max(jnp.abs(logits - ref)))
    print("KERNEL_OK")
</pallas_src>

<mosaic_0001>
module attributes {stable_mosaic.version = 11 : i64} {
  func.func @mlp_kernel(%arg0: i32, %arg1: memref<8x784xf32, #tpu.memory_space<vmem>>, %arg2: memref<784x512xbf16, #tpu.memory_space<vmem>>, %arg3: memref<1x512xf32, #tpu.memory_space<vmem>>, %arg4: memref<512x512xbf16, #tpu.memory_space<vmem>>, %arg5: memref<1x512xf32, #tpu.memory_space<vmem>>, %arg6: memref<512x10xbf16, #tpu.memory_space<vmem>>, %arg7: memref<1x10xf32, #tpu.memory_space<vmem>>, %arg8: memref<8x10xf32, #tpu.memory_space<vmem>>) attributes {dimension_semantics = [#tpu.dimension_semantics<parallel>], iteration_bounds = array<i64: 1>, scalar_prefetch = 0 : i64, scratch_operands = 0 : i64, tpu.core_type = #tpu.core_type<tc>, window_params = [{transform_indices = @transform_0, window_bounds = array<i64: 8, 784>}, {pipeline_mode = #tpu.pipeline_mode<synchronous>, transform_indices = @transform_1, window_bounds = array<i64: 784, 512>}, {pipeline_mode = #tpu.pipeline_mode<synchronous>, transform_indices = @transform_2, window_bounds = array<i64: 1, 512>}, {pipeline_mode = #tpu.pipeline_mode<synchronous>, transform_indices = @transform_3, window_bounds = array<i64: 512, 512>}, {pipeline_mode = #tpu.pipeline_mode<synchronous>, transform_indices = @transform_4, window_bounds = array<i64: 1, 512>}, {pipeline_mode = #tpu.pipeline_mode<synchronous>, transform_indices = @transform_5, window_bounds = array<i64: 512, 10>}, {pipeline_mode = #tpu.pipeline_mode<synchronous>, transform_indices = @transform_6, window_bounds = array<i64: 1, 10>}, {transform_indices = @transform_7, window_bounds = array<i64: 8, 10>}]} {
    %c0 = arith.constant 0 : index
    %c0_0 = arith.constant 0 : index
    %0 = vector.load %arg1[%c0, %c0_0] : memref<8x784xf32, #tpu.memory_space<vmem>>, vector<8x784xf32>
    %1 = arith.truncf %0 : vector<8x784xf32> to vector<8x784xbf16>
    %c0_1 = arith.constant 0 : index
    %c0_2 = arith.constant 0 : index
    %2 = vector.load %arg2[%c0_1, %c0_2] : memref<784x512xbf16, #tpu.memory_space<vmem>>, vector<784x512xbf16>
    %cst = arith.constant dense<0.000000e+00> : vector<8x512xf32>
    %3 = tpu.matmul %1, %2, %cst {dimension_numbers = #tpu.dot_dimension_numbers<[1], [0], [0], [1], [0, 0, 1, 1], [], []>} : vector<8x784xbf16>, vector<784x512xbf16>, vector<8x512xf32> -> vector<8x512xf32>
    %c0_3 = arith.constant 0 : index
    %c0_4 = arith.constant 0 : index
    %4 = vector.load %arg3[%c0_3, %c0_4] : memref<1x512xf32, #tpu.memory_space<vmem>>, vector<1x512xf32>
    %5 = vector.broadcast %4 : vector<1x512xf32> to vector<8x512xf32>
    %6 = arith.addf %3, %5 : vector<8x512xf32>
    %cst_5 = arith.constant 0.000000e+00 : f32
    %7 = vector.broadcast %cst_5 : f32 to vector<8x512xf32>
    %8 = arith.maximumf %6, %7 : vector<8x512xf32>
    %9 = arith.truncf %8 : vector<8x512xf32> to vector<8x512xbf16>
    %c0_6 = arith.constant 0 : index
    %c0_7 = arith.constant 0 : index
    %10 = vector.load %arg4[%c0_6, %c0_7] : memref<512x512xbf16, #tpu.memory_space<vmem>>, vector<512x512xbf16>
    %cst_8 = arith.constant dense<0.000000e+00> : vector<8x512xf32>
    %11 = tpu.matmul %9, %10, %cst_8 {dimension_numbers = #tpu.dot_dimension_numbers<[1], [0], [0], [1], [0, 0, 1, 1], [], []>} : vector<8x512xbf16>, vector<512x512xbf16>, vector<8x512xf32> -> vector<8x512xf32>
    %c0_9 = arith.constant 0 : index
    %c0_10 = arith.constant 0 : index
    %12 = vector.load %arg5[%c0_9, %c0_10] : memref<1x512xf32, #tpu.memory_space<vmem>>, vector<1x512xf32>
    %13 = vector.broadcast %12 : vector<1x512xf32> to vector<8x512xf32>
    %14 = arith.addf %11, %13 : vector<8x512xf32>
    %cst_11 = arith.constant 0.000000e+00 : f32
    %15 = vector.broadcast %cst_11 : f32 to vector<8x512xf32>
    %16 = arith.maximumf %14, %15 : vector<8x512xf32>
    %17 = arith.truncf %16 : vector<8x512xf32> to vector<8x512xbf16>
    %c0_12 = arith.constant 0 : index
    %c0_13 = arith.constant 0 : index
    %18 = vector.load %arg6[%c0_12, %c0_13] : memref<512x10xbf16, #tpu.memory_space<vmem>>, vector<512x10xbf16>
    %cst_14 = arith.constant dense<0.000000e+00> : vector<8x10xf32>
    %19 = tpu.matmul %17, %18, %cst_14 {dimension_numbers = #tpu.dot_dimension_numbers<[1], [0], [0], [1], [0, 0, 1, 1], [], []>} : vector<8x512xbf16>, vector<512x10xbf16>, vector<8x10xf32> -> vector<8x10xf32>
    %c0_15 = arith.constant 0 : index
    %c0_16 = arith.constant 0 : index
    %20 = vector.load %arg7[%c0_15, %c0_16] : memref<1x10xf32, #tpu.memory_space<vmem>>, vector<1x10xf32>
    %21 = vector.broadcast %20 : vector<1x10xf32> to vector<8x10xf32>
    %22 = arith.addf %19, %21 : vector<8x10xf32>
    %c0_17 = arith.constant 0 : index
    %c0_18 = arith.constant 0 : index
    %23 = vector.load %arg8[%c0_17, %c0_18] : memref<8x10xf32, #tpu.memory_space<vmem>>, vector<8x10xf32>
    tpu.vector_store %arg8[%c0_17, %c0_18], %22 {strides = array<i32>} : memref<8x10xf32, #tpu.memory_space<vmem>>, vector<8x10xf32>,
    return
  }
  func.func @transform_0(%arg0: i32) -> (i32, i32) {
    %c0_i32 = arith.constant 0 : i32
    %c0_i32_0 = arith.constant 0 : i32
    return %arg0, %c0_i32 : i32, i32
  }
  func.func @transform_1(%arg0: i32) -> (i32, i32) {
    %c0_i32 = arith.constant 0 : i32
    %c0_i32_0 = arith.constant 0 : i32
    %c0_i32_1 = arith.constant 0 : i32
    return %c0_i32, %c0_i32_0 : i32, i32
  }
  func.func @transform_2(%arg0: i32) -> (i32, i32) {
    %c0_i32 = arith.constant 0 : i32
    %c0_i32_0 = arith.constant 0 : i32
    %c0_i32_1 = arith.constant 0 : i32
    return %c0_i32, %c0_i32_0 : i32, i32
  }
  func.func @transform_3(%arg0: i32) -> (i32, i32) {
    %c0_i32 = arith.constant 0 : i32
    %c0_i32_0 = arith.constant 0 : i32
    %c0_i32_1 = arith.constant 0 : i32
    return %c0_i32, %c0_i32_0 : i32, i32
  }
  func.func @transform_4(%arg0: i32) -> (i32, i32) {
    %c0_i32 = arith.constant 0 : i32
    %c0_i32_0 = arith.constant 0 : i32
    %c0_i32_1 = arith.constant 0 : i32
    return %c0_i32, %c0_i32_0 : i32, i32
  }
  func.func @transform_5(%arg0: i32) -> (i32, i32) {
    %c0_i32 = arith.constant 0 : i32
    %c0_i32_0 = arith.constant 0 : i32
    %c0_i32_1 = arith.constant 0 : i32
    return %c0_i32, %c0_i32_0 : i32, i32
  }
  func.func @transform_6(%arg0: i32) -> (i32, i32) {
    %c0_i32 = arith.constant 0 : i32
    %c0_i32_0 = arith.constant 0 : i32
    %c0_i32_1 = arith.constant 0 : i32
    return %c0_i32, %c0_i32_0 : i32, i32
  }
  func.func @transform_7(%arg0: i32) -> (i32, i32) {
    %c0_i32 = arith.constant 0 : i32
    %c0_i32_0 = arith.constant 0 : i32
    return %arg0, %c0_i32 : i32, i32
  }
}

</mosaic_0001>

<bundles_post_ra>
// kernel: neural_network_forward.1
= control target key start
LH: loop header
LB: loop body
LE: loop exit
PB: predicated region body
PF: predicated region fallthrough
CT: control target
= control target key end

     0   :  { %12 = vsyncpa [#allocation3], 0  ;;  %s5143_s0 = inlined_call_operand.vmem [shape: f32[8,784], index: 0, kind: input, shape index: {}]   ;;  %s5144_s1 = inlined_call_operand.hbm [shape: bf16[784,512], index: 1, kind: input, shape index: {}]   ;;  %s5145_s2 = inlined_call_operand.vmem [shape: f32[1,512], index: 2, kind: input, shape index: {}]   ;;  %s5146_s3 = inlined_call_operand.hbm [shape: bf16[512,512], index: 3, kind: input, shape index: {}]   ;;  %s5147_s4 = inlined_call_operand.vmem [shape: f32[1,512], index: 4, kind: input, shape index: {}]   ;;  %s5148_s5 = inlined_call_operand.vmem [shape: bf16[512,10], index: 5, kind: input, shape index: {}]   ;;  %s5149_s6 = inlined_call_operand.vmem [shape: f32[1,10], index: 6, kind: input, shape index: {}]   ;;  %s5150_s7 = inlined_call_operand.hbm [shape: f32[8,10], index: 7, kind: output, shape index: {}]  }
   0x1   :  { %13 = vsyncpa [#allocation6], 0 }
   0x2   :  { %14 = vsyncpa [#allocation4], 0  ;;  %s21_s26 = sshll.u32 %s5144_s1, 4  ;;  %s4830_s27 = smov [#allocation2]   ;;  %s22_s26 = int_to_ptr.hbm [resolvable:$true] %s21_s26 }
   0x3   :  { %s23_s28 = sshll.u32 %s4830_s27, 4  ;;  %s36_s8 = sshll.u32 %s5146_s3, 4  ;;  %s24_s28 = int_to_ptr.vmem [resolvable:$true] %s23_s28  ;;  %s37_s8 = int_to_ptr.hbm [resolvable:$true] %s36_s8 }
   0x4   :  { %s4831_s9 = smov 256   ;;  %s4832_s10 = smov 16  }
   0x5   :  { %29 = dma.hbm_to_vmem [thread:$0]  %s22_s26, 25088, %s24_s28, [#allocation3], %s4831_s9, %s4831_s9, %s4832_s10  }
   0x6   :  { %s4833_s11 = smov [#allocation5]  }
   0x7   :  { %s38_s12 = sshll.u32 %s4833_s11, 4  ;;  %s39_s12 = int_to_ptr.vmem [resolvable:$true] %s38_s12 }
   0x8   :  { %44 = dma.hbm_to_vmem [thread:$0]  %s37_s8, 16384, %s39_s12, [#allocation6], %s4831_s9, %s4831_s9, %s4832_s10  }
   0x9   :  { %4824 = dma.done.wait [#allocation3], 25088  }
   0xa   :  { %4825 = vsyncadd [#allocation3], 4294942208 }
   0xb   :  { %4826 = dma.done.wait [#allocation6], 16384  }
   0xc   :  { %4827 = vsyncadd [#allocation6], 4294950912  ;;  %v3076_v0 = vld [vmem:[#allocation2 + $0xe0] sm:$0xf]  ;;  %v4420_v1 = vld [vmem:[#allocation2 + $0xec] sm:$0xf0] }
   0xd   :  { %v3204_v2 = vld [vmem:[#allocation2 + $0x1e0] sm:$0xf]  ;;  %v3077_v3 = vor.u32 %v4420_v1, %v3076_v0  ;;  %v4452_v4 = vld [vmem:[#allocation2 + $0x1ec] sm:$0xf0]  ;;  %vm1260_vm0 = vcmask 130048   ;;  %s4834_s12 = smov [#allocation7]  }
   0xe   :  { %v3332_v5 = vld [vmem:[#allocation2 + $0x2e0] sm:$0xf]  ;;  %v4484_v6 = vld [vmem:[#allocation2 + $0x2ec] sm:$0xf0]  ;;  %v3205_v7 = vor.u32 %v4452_v4, %v3204_v2  ;;  %s2949_s1 = sshll.u32 %s4834_s12, 4  ;;  %s2951_s14 = sshll.u32 %s5150_s7, 4  ;;  %s2950_s1 = int_to_ptr.vmem [resolvable:$true] %s2949_s1  ;;  %s2952_s14 = int_to_ptr.hbm [resolvable:$true] %s2951_s14 }
   0xf   :  { %v3333_v8 = vor.u32 %v4484_v6, %v3332_v5  ;;  %v3460_v9 = vld [vmem:[#allocation2 + $0x3e0] sm:$0xf]  ;;  %v4516_v10 = vld [vmem:[#allocation2 + $0x3ec] sm:$0xf0]  ;;  %1264 = vmatpush.bf16.msra.mxu0 %v3077_v3  ;;  %vm2942_vm1 = vcmask 80896  }
  0x10   :  { %v3060_v11 = vld [vmem:[#allocation2 + $0xc0] sm:$0xf]  ;;  %v3461_v12 = vor.u32 %v4516_v10, %v3460_v9  ;;  %v4416_v13 = vld [vmem:[#allocation2 + $0xcc] sm:$0xf0]  ;;  %1277 = vmatpush.bf16.msra.mxu1 %v3205_v7 }
  0x11   :  { %v3188_v14 = vld [vmem:[#allocation2 + $0x1c0] sm:$0xf]  ;;  %v4448_v15 = vld [vmem:[#allocation2 + $0x1cc] sm:$0xf0]  ;;  %1290 = vmatpush.bf16.msra.mxu2 %v3333_v8  ;;  %v3061_v16 = vor.u32 %v4416_v13, %v3060_v11 }
  0x12   :  { %v3189_v17 = vor.u32 %v4448_v15, %v3188_v14  ;;  %v3316_v18 = vld [vmem:[#allocation2 + $0x2c0] sm:$0xf]  ;;  %v4480_v19 = vld [vmem:[#allocation2 + $0x2cc] sm:$0xf0]  ;;  %1303 = vmatpush.bf16.msra.mxu3 %v3461_v12 }
  0x13   :  { %v3444_v20 = vld [vmem:[#allocation2 + $0x3c0] sm:$0xf]  ;;  %v3317_v21 = vor.u32 %v4480_v19, %v3316_v18  ;;  %v4512_v22 = vld [vmem:[#allocation2 + $0x3cc] sm:$0xf0]  ;;  %1265 = vmatpush.bf16.msra.mxu0 %v3061_v16 }
  0x14   :  { %v3044_v23 = vld [vmem:[#allocation2 + $0xa0] sm:$0xf]  ;;  %v4412_v24 = vld [vmem:[#allocation2 + $0xac] sm:$0xf0]  ;;  %v3445_v25 = vor.u32 %v4512_v22, %v3444_v20  ;;  %1278 = vmatpush.bf16.msra.mxu1 %v3189_v17 }
  0x15   :  { %v3172_v26 = vld [vmem:[#allocation2 + $0x1a0] sm:$0xf]  ;;  %v4444_v27 = vld [vmem:[#allocation2 + $0x1ac] sm:$0xf0]  ;;  %v3045_v29 = vor.u32 %v4412_v24, %v3044_v23  ;;  %1291 = vmatpush.bf16.msra.mxu2 %v3317_v21 }
  0x16   :  { %v3300_v28 = vld [vmem:[#allocation2 + $0x2a0] sm:$0xf]  ;;  %v4476_v30 = vld [vmem:[#allocation2 + $0x2ac] sm:$0xf0]  ;;  %v3173_v33 = vor.u32 %v4444_v27, %v3172_v26  ;;  %1304 = vmatpush.bf16.msra.mxu3 %v3445_v25 }
  0x17   :  { %v3428_v31 = vld [vmem:[#allocation2 + $0x3a0] sm:$0xf]  ;;  %v4508_v32 = vld [vmem:[#allocation2 + $0x3ac] sm:$0xf0]  ;;  %v3301_v34 = vor.u32 %v4476_v30, %v3300_v28  ;;  %1266 = vmatpush.bf16.msra.mxu0 %v3045_v29 }
  0x18   :  { %v3028_v35 = vld [vmem:[#allocation2 + $0x80] sm:$0xf]  ;;  %v4408_v36 = vld [vmem:[#allocation2 + $0x8c] sm:$0xf0]  ;;  %v3429_v38 = vor.u32 %v4508_v32, %v3428_v31  ;;  %1279 = vmatpush.bf16.msra.mxu1 %v3173_v33  ;;  %v4418_v33 = vld [vmem:[#allocation2 + $0xe4] sm:$0xf] }
  0x19   :  { %v3156_v37 = vld [vmem:[#allocation2 + $0x180] sm:$0xf]  ;;  %v4440_v39 = vld [vmem:[#allocation2 + $0x18c] sm:$0xf0]  ;;  %v3029_v44 = vor.u32 %v4408_v36, %v3028_v35  ;;  %1292 = vmatpush.bf16.msra.mxu2 %v3301_v34  ;;  %v3078_v34 = vld [vmem:[#allocation2 + $0xf0] sm:$0xf0] }
  0x1a   :  { %v3284_v40 = vld [vmem:[#allocation2 + $0x280] sm:$0xf]  ;;  %v4472_v41 = vld [vmem:[#allocation2 + $0x28c] sm:$0xf0]  ;;  %v3157_v45 = vor.u32 %v4440_v39, %v3156_v37  ;;  %1305 = vmatpush.bf16.msra.mxu3 %v3429_v38 }
  0x1b   :  { %v3412_v42 = vld [vmem:[#allocation2 + $0x380] sm:$0xf]  ;;  %v4504_v43 = vld [vmem:[#allocation2 + $0x38c] sm:$0xf0]  ;;  %v3285_v46 = vor.u32 %v4472_v41, %v3284_v40  ;;  %1267 = vmatpush.bf16.msra.mxu0 %v3029_v44  ;;  %v3206_v44 = vld [vmem:[#allocation2 + $0x1f0] sm:$0xf0] }
  0x1c   :  { %v3012_v47 = vld [vmem:[#allocation2 + $0x60] sm:$0xf]  ;;  %v4404_v48 = vld [vmem:[#allocation2 + $0x6c] sm:$0xf0]  ;;  %v3413_v50 = vor.u32 %v4504_v43, %v3412_v42  ;;  %1280 = vmatpush.bf16.msra.mxu1 %v3157_v45  ;;  %v4450_v43 = vld [vmem:[#allocation2 + $0x1e4] sm:$0xf] }
  0x1d   :  { %v3140_v49 = vld [vmem:[#allocation2 + $0x160] sm:$0xf]  ;;  %v4436_v51 = vld [vmem:[#allocation2 + $0x16c] sm:$0xf0]  ;;  %v3013_v56 = vor.u32 %v4404_v48, %v3012_v47  ;;  %1293 = vmatpush.bf16.msra.mxu2 %v3285_v46  ;;  %v63_v45 = vld [vmem:[%s5143_s0 + $0x18] sm:$0xff]  ;;  %v3081_v47 = vor.u32 %v4418_v33, %v3078_v34 }
  0x1e   :  { %v3268_v52 = vld [vmem:[#allocation2 + $0x260] sm:$0xf]  ;;  %v4468_v53 = vld [vmem:[#allocation2 + $0x26c] sm:$0xf0]  ;;  %v3141_v57 = vor.u32 %v4436_v51, %v3140_v49  ;;  %1306 = vmatpush.bf16.msra.mxu3 %v3413_v50 }
  0x1f   :  { %v3396_v54 = vld [vmem:[#allocation2 + $0x360] sm:$0xf]  ;;  %v4500_v55 = vld [vmem:[#allocation2 + $0x36c] sm:$0xf0]  ;;  %v3269_v58 = vor.u32 %v4468_v53, %v3268_v52  ;;  %1268 = vmatpush.bf16.msra.mxu0 %v3013_v56  ;;  %v4414_v53 = vld [vmem:[#allocation2 + $0xc4] sm:$0xf] }
  0x20   :  { %v2996_v59 = vld [vmem:[#allocation2 + $0x40] sm:$0xf]  ;;  %v4400_v60 = vld [vmem:[#allocation2 + $0x4c] sm:$0xf0]  ;;  %v3397_v62 = vor.u32 %v4500_v55, %v3396_v54  ;;  %1281 = vmatpush.bf16.msra.mxu1 %v3141_v57  ;;  %v3062_v54 = vld [vmem:[#allocation2 + $0xd0] sm:$0xf0]  ;;  %v4894_v57 = vpack.c.bf16 %v63_v45, %v63_v45 }
  0x21   :  { %v3124_v61 = vld [vmem:[#allocation2 + $0x140] sm:$0xf]  ;;  %v4432_v63 = vld [vmem:[#allocation2 + $0x14c] sm:$0xf0]  ;;  %v2997_v4 = vor.u32 %v4400_v60, %v2996_v59  ;;  %1294 = vmatpush.bf16.msra.mxu2 %v3269_v58  ;;  %v61_v58 = vld [vmem:[%s5143_s0 + $0x8] sm:$0xff]  ;;  %v3209_v59 = vor.u32 %v4450_v43, %v3206_v44 }
  0x22   :  { %v3252_v0 = vld [vmem:[#allocation2 + $0x240] sm:$0xf]  ;;  %v4464_v1 = vld [vmem:[#allocation2 + $0x24c] sm:$0xf0]  ;;  %v3125_v5 = vor.u32 %v4432_v63, %v3124_v61  ;;  %1307 = vmatpush.bf16.msra.mxu3 %v3397_v62  ;;  %v4446_v61 = vld [vmem:[#allocation2 + $0x1c4] sm:$0xf] }
  0x23   :  { %v3380_v2 = vld [vmem:[#allocation2 + $0x340] sm:$0xf]  ;;  %v4496_v3 = vld [vmem:[#allocation2 + $0x34c] sm:$0xf0]  ;;  %v3253_v6 = vor.u32 %v4464_v1, %v3252_v0  ;;  %1269 = vmatpush.bf16.msra.mxu0 %v2997_v4  ;;  %v3190_v62 = vld [vmem:[#allocation2 + $0x1d0] sm:$0xf0]  ;;  %v3065_v0 = vor.u32 %v4414_v53, %v3062_v54 }
  0x24   :  { %v2980_v7 = vld [vmem:[#allocation2 + $0x20] sm:$0xf]  ;;  %v4396_v8 = vld [vmem:[#allocation2 + $0x2c] sm:$0xf0]  ;;  %v3381_v10 = vor.u32 %v4496_v3, %v3380_v2  ;;  %1282 = vmatpush.bf16.msra.mxu1 %v3125_v5  ;;  %v4410_v5 = vld [vmem:[#allocation2 + $0xa4] sm:$0xf] }
  0x25   :  { %v3108_v9 = vld [vmem:[#allocation2 + $0x120] sm:$0xf]  ;;  %v4428_v11 = vld [vmem:[#allocation2 + $0x12c] sm:$0xf0]  ;;  %v2981_v16 = vor.u32 %v4396_v8, %v2980_v7  ;;  %1295 = vmatpush.bf16.msra.mxu2 %v3253_v6  ;;  %v3046_v6 = vld [vmem:[#allocation2 + $0xb0] sm:$0xf0]  ;;  %v4901_v7 = vpack.c.bf16 %v61_v58, %v61_v58  ;;  %v3193_v8 = vor.u32 %v4446_v61, %v3190_v62 }
  0x26   :  { %v3236_v12 = vld [vmem:[#allocation2 + $0x220] sm:$0xf]  ;;  %v4460_v13 = vld [vmem:[#allocation2 + $0x22c] sm:$0xf0]  ;;  %v3109_v20 = vor.u32 %v4428_v11, %v3108_v9  ;;  %1308 = vmatpush.bf16.msra.mxu3 %v3381_v10  ;;  %v4442_v10 = vld [vmem:[#allocation2 + $0x1a4] sm:$0xf] }
  0x27   :  { %v3364_v14 = vld [vmem:[#allocation2 + $0x320] sm:$0xf]  ;;  %v4492_v15 = vld [vmem:[#allocation2 + $0x32c] sm:$0xf0]  ;;  %v3237_v21 = vor.u32 %v4460_v13, %v3236_v12  ;;  %1270 = vmatpush.bf16.msra.mxu0 %v2981_v16  ;;  %v3174_v11 = vld [vmem:[#allocation2 + $0x1b0] sm:$0xf0]  ;;  %v3049_v13 = vor.u32 %v4410_v5, %v3046_v6 }
  0x28   :  { %v2964_v17 = vld [vmem:[#allocation2] sm:$0xf]  ;;  %v4392_v18 = vld [vmem:[#allocation2 + $0xc] sm:$0xf0]  ;;  %v3365_v25 = vor.u32 %v4492_v15, %v3364_v14  ;;  %1283 = vmatpush.bf16.msra.mxu1 %v3109_v20  ;;  %v3177_v20 = vor.u32 %v4442_v10, %v3174_v11  ;;  %v4398_v43 = vld [vmem:[#allocation2 + $0x44] sm:$0xf] }
  0x29   :  { %v3092_v19 = vld [vmem:[#allocation2 + $0x100] sm:$0xf]  ;;  %v4424_v22 = vld [vmem:[#allocation2 + $0x10c] sm:$0xf0]  ;;  %v2965_v32 = vor.u32 %v4392_v18, %v2964_v17  ;;  %1296 = vmatpush.bf16.msra.mxu2 %v3237_v21  ;;  %v4406_v18 = vld [vmem:[#allocation2 + $0x84] sm:$0xf] }
  0x2a   :  { %v3220_v23 = vld [vmem:[#allocation2 + $0x200] sm:$0xf]  ;;  %v4456_v24 = vld [vmem:[#allocation2 + $0x20c] sm:$0xf0]  ;;  %v3093_v36 = vor.u32 %v4424_v22, %v3092_v19  ;;  %1309 = vmatpush.bf16.msra.mxu3 %v3365_v25  ;;  %v3030_v19 = vld [vmem:[#allocation2 + $0x90] sm:$0xf0] }
  0x2b   :  { %v3348_v26 = vld [vmem:[#allocation2 + $0x300] sm:$0xf]  ;;  %v4488_v27 = vld [vmem:[#allocation2 + $0x30c] sm:$0xf0]  ;;  %v3221_v37 = vor.u32 %v4456_v24, %v3220_v23  ;;  %1271 = vmatpush.bf16.msra.mxu0 %v2965_v32  ;;  %v4438_v22 = vld [vmem:[#allocation2 + $0x184] sm:$0xf]  ;;  %v3033_v25 = vor.u32 %v4406_v18, %v3030_v19 }
  0x2c   :  { %v3588_v28 = vld [vmem:[#allocation2 + $0x4e0] sm:$0xf]  ;;  %v4548_v29 = vld [vmem:[#allocation2 + $0x4ec] sm:$0xf0]  ;;  %v3349_v41 = vor.u32 %v4488_v27, %v3348_v26  ;;  %1284 = vmatpush.bf16.msra.mxu1 %v3093_v36  ;;  %v3158_v23 = vld [vmem:[#allocation2 + $0x190] sm:$0xf0] }
  0x2d   :  { %v3716_v30 = vld [vmem:[#allocation2 + $0x5e0] sm:$0xf]  ;;  %v4580_v31 = vld [vmem:[#allocation2 + $0x5ec] sm:$0xf0]  ;;  %v3589_v42 = vor.u32 %v4548_v29, %v3588_v28  ;;  %1297 = vmatpush.bf16.msra.mxu2 %v3221_v37  ;;  %v3161_v33 = vor.u32 %v4438_v22, %v3158_v23  ;;  %v3142_v36 = vld [vmem:[#allocation2 + $0x170] sm:$0xf0] }
  0x2e   :  { %v62_v35 = vld [vmem:[%s5143_s0 + $0x10] sm:$0xff]  ;;  %v3732_v38 = vld [vmem:[#allocation2 + $0x600] sm:$0xf]  ;;  %v3717_v46 = vor.u32 %v4580_v31, %v3716_v30  ;;  %1310 = vmatpush.bf16.msra.mxu3 %v3349_v41  ;;  %v4402_v30 = vld [vmem:[#allocation2 + $0x64] sm:$0xf] }
  0x2f   :  { %v4584_v39 = vld [vmem:[#allocation2 + $0x60c] sm:$0xf0]  ;;  %v60_v40 = vld [vmem:[%s5143_s0] sm:$0xff]  ;;  %v4890_v51 = vpack.c.bf16 %v62_v35, %v62_v35  ;;  %1316 = vmatpush.bf16.msrb.mxu0 %v3589_v42  ;;  %1285 = vmatmul.bf16.vlgmr.msra.gmra.mxu1 %v4901_v7  ;;  %v3014_v31 = vld [vmem:[#allocation2 + $0x70] sm:$0xf0] }
  0x30   :  { %v3572_v48 = vld [vmem:[#allocation2 + $0x4c0] sm:$0xf]  ;;  %v4544_v49 = vld [vmem:[#allocation2 + $0x4cc] sm:$0xf0]  ;;  %v4892_v55 = vpack.c.bf16 %v60_v40, %v60_v40  ;;  %v3733_v56 = vor.u32 %v4584_v39, %v3732_v38  ;;  %1329 = vmatpush.bf16.msrb.mxu1 %v3717_v46  ;;  %v4434_v35 = vld [vmem:[#allocation2 + $0x164] sm:$0xf]  ;;  %v3017_v38 = vor.u32 %v4402_v30, %v3014_v31 }
  0x31   :  { %v3700_v50 = vld [vmem:[#allocation2 + $0x5c0] sm:$0xf]  ;;  %v4576_v52 = vld [vmem:[#allocation2 + $0x5cc] sm:$0xf0]  ;;  %v3573_v60 = vor.u32 %v4544_v49, %v3572_v48  ;;  %1298 = vmatmul.bf16.vlgmr.msra.gmra.mxu2 %v4890_v51  ;;  %1311 = vmatmul.bf16.vlgmr.msra.gmra.mxu3 %v4894_v57  ;;  %v2998_v44 = vld [vmem:[#allocation2 + $0x50] sm:$0xf0]  ;;  %v3145_v46 = vor.u32 %v4434_v35, %v3142_v36 }
  0x32   :  { %1355 = vmatpush.bf16.msrb.mxu3 %v3081_v47  ;;  %v3701_v63 = vor.u32 %v4576_v52, %v3700_v50  ;;  %v3556_v1 = vld [vmem:[#allocation2 + $0x4a0] sm:$0xf]  ;;  %v4540_v2 = vld [vmem:[#allocation2 + $0x4ac] sm:$0xf0]  ;;  %1272 = vmatmul.bf16.vlgmr.msra.gmra.mxu0 %v4892_v55  ;;  %v4430_v48 = vld [vmem:[#allocation2 + $0x144] sm:$0xf]  ;;  %v3001_v52 = vor.u32 %v4398_v43, %v2998_v44 }
  0x33   :  { %v3684_v3 = vld [vmem:[#allocation2 + $0x5a0] sm:$0xf]  ;;  %v4572_v4 = vld [vmem:[#allocation2 + $0x5ac] sm:$0xf0]  ;;  %1349 = vmatpush.bf16.msrb.mxu2 %v3733_v56  ;;  %1317 = vmatpush.bf16.msrb.mxu0 %v3573_v60  ;;  %v3557_v9 = vor.u32 %v4540_v2, %v3556_v1  ;;  %v3126_v49 = vld [vmem:[#allocation2 + $0x150] sm:$0xf0] }
  0x34   :  { %1330 = vmatpush.bf16.msrb.mxu1 %v3701_v63  ;;  %v3685_v12 = vor.u32 %v4572_v4, %v3684_v3  ;;  %v3540_v14 = vld [vmem:[#allocation2 + $0x480] sm:$0xf]  ;;  %v4536_v15 = vld [vmem:[#allocation2 + $0x48c] sm:$0xf0]  ;;  %v2982_v60 = vld [vmem:[#allocation2 + $0x30] sm:$0xf0]  ;;  %v3129_v61 = vor.u32 %v4430_v48, %v3126_v49 }
  0x35   :  { %v3668_v16 = vld [vmem:[#allocation2 + $0x580] sm:$0xf]  ;;  %v4568_v17 = vld [vmem:[#allocation2 + $0x58c] sm:$0xf0]  ;;  %v3541_v21 = vor.u32 %v4536_v15, %v3540_v14  ;;  %v4426_v63 = vld [vmem:[#allocation2 + $0x124] sm:$0xf] }
  0x36   :  { %1356 = vmatpush.bf16.msrb.mxu3 %v3065_v0  ;;  %v3669_v24 = vor.u32 %v4568_v17, %v3668_v16  ;;  %v3524_v26 = vld [vmem:[#allocation2 + $0x460] sm:$0xf]  ;;  %v4532_v27 = vld [vmem:[#allocation2 + $0x46c] sm:$0xf0]  ;;  %v3110_v0 = vld [vmem:[#allocation2 + $0x130] sm:$0xf0] }
  0x37   :  { %1368 = vmatpush.bf16.msra.mxu2 %v3209_v59  ;;  %1318 = vmatpush.bf16.msrb.mxu0 %v3557_v9  ;;  %v3652_v28 = vld [vmem:[#allocation2 + $0x560] sm:$0xf]  ;;  %v4564_v29 = vld [vmem:[#allocation2 + $0x56c] sm:$0xf0]  ;;  %v3525_v34 = vor.u32 %v4532_v27, %v3524_v26  ;;  %v4394_v59 = vld [vmem:[#allocation2 + $0x24] sm:$0xf]  ;;  %v3113_v14 = vor.u32 %v4426_v63, %v3110_v0 }
  0x38   :  { %1331 = vmatpush.bf16.msrb.mxu1 %v3685_v12  ;;  %v66_v32 = vld [vmem:[%s5143_s0 + $0x30] sm:$0xff]  ;;  %v3653_v37 = vor.u32 %v4564_v29, %v3652_v28  ;;  %v3508_v39 = vld [vmem:[#allocation2 + $0x440] sm:$0xf]  ;;  %v2985_v3 = vor.u32 %v4394_v59, %v2982_v60  ;;  %v4482_v10 = vld [vmem:[#allocation2 + $0x2e4] sm:$0xf] }
  0x39   :  { %v4528_v40 = vld [vmem:[#allocation2 + $0x44c] sm:$0xf0]  ;;  %v3636_v41 = vld [vmem:[#allocation2 + $0x540] sm:$0xf]  ;;  %v4908_v45 = vpack.c.bf16 %v66_v32, %v66_v32  ;;  %v2966_v9 = vld [vmem:[#allocation2 + $0x10] sm:$0xf0] }
  0x3a   :  { %1357 = vmatpush.bf16.msrb.mxu3 %v3049_v13  ;;  %v4560_v42 = vld [vmem:[#allocation2 + $0x54c] sm:$0xf0]  ;;  %v3509_v47 = vor.u32 %v4528_v40, %v3508_v39  ;;  %v3492_v53 = vld [vmem:[#allocation2 + $0x420] sm:$0xf]  ;;  %v3334_v11 = vld [vmem:[#allocation2 + $0x2f0] sm:$0xf0] }
  0x3b   :  { %1369 = vmatpush.bf16.msra.mxu2 %v3193_v8  ;;  %1319 = vmatpush.bf16.msrb.mxu0 %v3541_v21  ;;  %v3637_v50 = vor.u32 %v4560_v42, %v3636_v41  ;;  %v4524_v54 = vld [vmem:[#allocation2 + $0x42c] sm:$0xf0]  ;;  %v3620_v56 = vld [vmem:[#allocation2 + $0x520] sm:$0xf]  ;;  %v4390_v8 = vld [vmem:[#allocation2 + $0x4] sm:$0xf] }
  0x3c   :  { %1332 = vmatpush.bf16.msrb.mxu1 %v3669_v24  ;;  %v4556_v58 = vld [vmem:[#allocation2 + $0x52c] sm:$0xf0]  ;;  %v3493_v62 = vor.u32 %v4524_v54, %v3492_v53  ;;  %v3476_v1 = vld [vmem:[#allocation2 + $0x400] sm:$0xf]  ;;  %v4514_v12 = vld [vmem:[#allocation2 + $0x3e4] sm:$0xf]  ;;  %v3337_v24 = vor.u32 %v4482_v10, %v3334_v11 }
  0x3d   :  { %v3621_v2 = vor.u32 %v4556_v58, %v3620_v56  ;;  %v4520_v4 = vld [vmem:[#allocation2 + $0x40c] sm:$0xf0]  ;;  %v3604_v5 = vld [vmem:[#allocation2 + $0x500] sm:$0xf]  ;;  %v3462_v13 = vld [vmem:[#allocation2 + $0x3f0] sm:$0xf0] }
  0x3e   :  { %1358 = vmatpush.bf16.msrb.mxu3 %v3033_v25  ;;  %v4552_v6 = vld [vmem:[#allocation2 + $0x50c] sm:$0xf0]  ;;  %v3477_v15 = vor.u32 %v4520_v4, %v3476_v1  ;;  %v4546_v16 = vld [vmem:[#allocation2 + $0x4e4] sm:$0xf]  ;;  %v3590_v17 = vld [vmem:[#allocation2 + $0x4f0] sm:$0xf0]  ;;  %v3465_v25 = vor.u32 %v4514_v12, %v3462_v13 }
  0x3f   :  { %1370 = vmatpush.bf16.msra.mxu2 %v3177_v20  ;;  %1320 = vmatpush.bf16.msrb.mxu0 %v3525_v34  ;;  %v64_v18 = vld [vmem:[%s5143_s0 + $0x20] sm:$0xff]  ;;  %v3605_v19 = vor.u32 %v4552_v6, %v3604_v5  ;;  %v2969_v20 = vor.u32 %v4390_v8, %v2966_v9  ;;  %v3094_v22 = vld [vmem:[#allocation2 + $0x110] sm:$0xf0]  ;;  %v65_v23 = vld [vmem:[%s5143_s0 + $0x28] sm:$0xff]  ;;  %v3593_v29 = vor.u32 %v4546_v16, %v3590_v17 }
  0x40   :  { %1333 = vmatpush.bf16.msrb.mxu1 %v3653_v37  ;;  %v4422_v21 = vld [vmem:[#allocation2 + $0x104] sm:$0xf]  ;;  %v3718_v27 = vld [vmem:[#allocation2 + $0x5f0] sm:$0xf0]  ;;  %v4918_v30 = vpack.c.bf16 %v64_v18, %v64_v18  ;;  %v4920_v35 = vpack.c.bf16 %v65_v23, %v65_v23 }
  0x41   :  { %3746 = vmatmul.msk.bf16.vlgmr.msrb.gmra.mxu2 %vm1260_vm0, %v4908_v45  ;;  %v4578_v26 = vld [vmem:[#allocation2 + $0x5e4] sm:$0xf]  ;;  %v3318_v31 = vld [vmem:[#allocation2 + $0x2d0] sm:$0xf0]  ;;  %v3097_v34 = vor.u32 %v4422_v21, %v3094_v22 }
  0x42   :  { %1359 = vmatpush.bf16.msrb.mxu3 %v3017_v38  ;;  %v4478_v28 = vld [vmem:[#allocation2 + $0x2c4] sm:$0xf]  ;;  %v3574_v37 = vld [vmem:[#allocation2 + $0x4d0] sm:$0xf0]  ;;  %v3721_v38 = vor.u32 %v4578_v26, %v3718_v27 }
  0x43   :  { %1371 = vmatpush.bf16.msra.mxu2 %v3161_v33  ;;  %1321 = vmatpush.bf16.msrb.mxu0 %v3509_v47  ;;  %v4510_v32 = vld [vmem:[#allocation2 + $0x3c4] sm:$0xf]  ;;  %v3446_v33 = vld [vmem:[#allocation2 + $0x3d0] sm:$0xf0]  ;;  %v3321_v39 = vor.u32 %v4478_v28, %v3318_v31 }
  0x44   :  { %1334 = vmatpush.bf16.msrb.mxu1 %v3637_v50  ;;  %v4542_v36 = vld [vmem:[#allocation2 + $0x4c4] sm:$0xf]  ;;  %v3449_v40 = vor.u32 %v4510_v32, %v3446_v33  ;;  %v3702_v42 = vld [vmem:[#allocation2 + $0x5d0] sm:$0xf0] }
  0x45   :  { %v4574_v41 = vld [vmem:[#allocation2 + $0x5c4] sm:$0xf]  ;;  %v3577_v44 = vor.u32 %v4542_v36, %v3574_v37  ;;  %v3430_v48 = vld [vmem:[#allocation2 + $0x3b0] sm:$0xf0] }
  0x46   :  { %1360 = vmatpush.bf16.msrb.mxu3 %v3001_v52  ;;  %v4474_v43 = vld [vmem:[#allocation2 + $0x2a4] sm:$0xf]  ;;  %v3558_v50 = vld [vmem:[#allocation2 + $0x4b0] sm:$0xf0]  ;;  %v3705_v52 = vor.u32 %v4574_v41, %v3702_v42 }
  0x47   :  { %1372 = vmatpush.bf16.msra.mxu2 %v3145_v46  ;;  %1322 = vmatpush.bf16.msrb.mxu0 %v3493_v62  ;;  %v3302_v46 = vld [vmem:[#allocation2 + $0x2b0] sm:$0xf0]  ;;  %v4506_v47 = vld [vmem:[#allocation2 + $0x3a4] sm:$0xf] }
  0x48   :  { %1335 = vmatpush.bf16.msrb.mxu1 %v3621_v2  ;;  %v4538_v49 = vld [vmem:[#allocation2 + $0x4a4] sm:$0xf]  ;;  %v3305_v53 = vor.u32 %v4474_v43, %v3302_v46  ;;  %v3433_v54 = vor.u32 %v4506_v47, %v3430_v48  ;;  %v3686_v58 = vld [vmem:[#allocation2 + $0x5b0] sm:$0xf0] }
  0x49   :  { %v4570_v56 = vld [vmem:[#allocation2 + $0x5a4] sm:$0xf]  ;;  %v3561_v60 = vor.u32 %v4538_v49, %v3558_v50  ;;  %v3414_v63 = vld [vmem:[#allocation2 + $0x390] sm:$0xf0] }
  0x4a   :  { %1361 = vmatpush.bf16.msrb.mxu3 %v2985_v3  ;;  %v4470_v59 = vld [vmem:[#allocation2 + $0x284] sm:$0xf]  ;;  %v3542_v1 = vld [vmem:[#allocation2 + $0x490] sm:$0xf0]  ;;  %v3689_v2 = vor.u32 %v4570_v56, %v3686_v58  ;;  %v3084_v56 = vld [vmem:[#allocation2 + $0xe8] sm:$0xf] }
  0x4b   :  { %1373 = vmatpush.bf16.msra.mxu2 %v3129_v61  ;;  %1323 = vmatpush.bf16.msrb.mxu0 %v3477_v15  ;;  %v3286_v61 = vld [vmem:[#allocation2 + $0x290] sm:$0xf0]  ;;  %v4502_v62 = vld [vmem:[#allocation2 + $0x384] sm:$0xf]  ;;  %v4421_v58 = vld [vmem:[#allocation2 + $0xf4] sm:$0xf0] }
  0x4c   :  { %1336 = vmatpush.bf16.msrb.mxu1 %v3605_v19  ;;  %v4534_v0 = vld [vmem:[#allocation2 + $0x484] sm:$0xf]  ;;  %v3289_v3 = vor.u32 %v4470_v59, %v3286_v61  ;;  %v3417_v4 = vor.u32 %v4502_v62, %v3414_v63  ;;  %v3670_v6 = vld [vmem:[#allocation2 + $0x590] sm:$0xf0]  ;;  %v3340_v62 = vld [vmem:[#allocation2 + $0x2e8] sm:$0xf] }
  0x4d   :  { %v4566_v5 = vld [vmem:[#allocation2 + $0x584] sm:$0xf]  ;;  %v3545_v9 = vor.u32 %v4534_v0, %v3542_v1  ;;  %v3270_v10 = vld [vmem:[#allocation2 + $0x270] sm:$0xf0]  ;;  %v4485_v63 = vld [vmem:[#allocation2 + $0x2f4] sm:$0xf0] }
  0x4e   :  { %1362 = vmatpush.bf16.msrb.mxu3 %v2969_v20  ;;  %1324 = vmatmul.bf16.vlgmr.msrb.gmra.mxu0 %v4918_v30  ;;  %v4466_v8 = vld [vmem:[#allocation2 + $0x264] sm:$0xf]  ;;  %v3398_v12 = vld [vmem:[#allocation2 + $0x370] sm:$0xf0]  ;;  %v3673_v15 = vor.u32 %v4566_v5, %v3670_v6  ;;  %v3085_v5 = vor.u32 %v4421_v58, %v3084_v56  ;;  %v3468_v6 = vld [vmem:[#allocation2 + $0x3e8] sm:$0xf] }
  0x4f   :  { %1374 = vmatpush.bf16.msra.mxu2 %v3113_v14  ;;  %1381 = vmatpush.bf16.msra.mxu0 %v3337_v24  ;;  %v4498_v11 = vld [vmem:[#allocation2 + $0x364] sm:$0xf]  ;;  %v3526_v14 = vld [vmem:[#allocation2 + $0x470] sm:$0xf0]  ;;  %v3273_v16 = vor.u32 %v4466_v8, %v3270_v10  ;;  %v4517_v8 = vld [vmem:[#allocation2 + $0x3f4] sm:$0xf0] }
  0x50   :  { %1394 = vmatpush.bf16.msra.mxu1 %v3465_v25  ;;  %v4530_v13 = vld [vmem:[#allocation2 + $0x464] sm:$0xf]  ;;  %v3401_v17 = vor.u32 %v4498_v11, %v3398_v12  ;;  %v3654_v19 = vld [vmem:[#allocation2 + $0x570] sm:$0xf0]  ;;  %v3212_v10 = vld [vmem:[#allocation2 + $0x1e8] sm:$0xf]  ;;  %v3341_v12 = vor.u32 %v4485_v63, %v3340_v62 }
  0x51   :  { %1337 = vmatmul.bf16.vlgmr.msrb.gmra.mxu1 %v4920_v35  ;;  %1363 = vmatmul.bf16.vlgmr.msrb.gmra.mxu3 %v4892_v55  ;;  %v4562_v18 = vld [vmem:[#allocation2 + $0x564] sm:$0xf]  ;;  %v3529_v21 = vor.u32 %v4530_v13, %v3526_v14  ;;  %v3254_v22 = vld [vmem:[#allocation2 + $0x250] sm:$0xf0]  ;;  %v4453_v11 = vld [vmem:[#allocation2 + $0x1f4] sm:$0xf0] }
  0x52   :  { %1407 = vmatpush.bf16.msra.mxu3 %v3593_v29  ;;  %v4462_v20 = vld [vmem:[#allocation2 + $0x244] sm:$0xf]  ;;  %v3382_v24 = vld [vmem:[#allocation2 + $0x350] sm:$0xf0]  ;;  %v3657_v27 = vor.u32 %v4562_v18, %v3654_v19  ;;  %v3068_v14 = vld [vmem:[#allocation2 + $0xc8] sm:$0xf]  ;;  %v3213_v19 = vor.u32 %v4453_v11, %v3212_v10 }
  0x53   :  { %1375 = vmatpush.bf16.msra.mxu2 %v3097_v34  ;;  %1382 = vmatpush.bf16.msra.mxu0 %v3321_v39  ;;  %v4494_v23 = vld [vmem:[#allocation2 + $0x344] sm:$0xf]  ;;  %v3510_v26 = vld [vmem:[#allocation2 + $0x450] sm:$0xf0]  ;;  %v3257_v28 = vor.u32 %v4462_v20, %v3254_v22  ;;  %v4481_v18 = vld [vmem:[#allocation2 + $0x2d4] sm:$0xf0] }
  0x54   :  { %1395 = vmatpush.bf16.msra.mxu1 %v3449_v40  ;;  %v4526_v25 = vld [vmem:[#allocation2 + $0x444] sm:$0xf]  ;;  %v3385_v29 = vor.u32 %v4494_v23, %v3382_v24  ;;  %v3638_v32 = vld [vmem:[#allocation2 + $0x550] sm:$0xf0]  ;;  %v3452_v20 = vld [vmem:[#allocation2 + $0x3c8] sm:$0xf] }
  0x55   :  { %v4558_v31 = vld [vmem:[#allocation2 + $0x544] sm:$0xf]  ;;  %v3513_v34 = vor.u32 %v4526_v25, %v3510_v26  ;;  %v3238_v36 = vld [vmem:[#allocation2 + $0x230] sm:$0xf0]  ;;  %v3196_v23 = vld [vmem:[#allocation2 + $0x1c8] sm:$0xf] }
  0x56   :  { %1408 = vmatpush.bf16.msra.mxu3 %v3577_v44  ;;  %1376 = vmatmul.bf16.vlgmr.msra.gmra.mxu2 %v4901_v7  ;;  %v4458_v33 = vld [vmem:[#allocation2 + $0x224] sm:$0xf]  ;;  %v3494_v40 = vld [vmem:[#allocation2 + $0x430] sm:$0xf0]  ;;  %v3641_v41 = vor.u32 %v4558_v31, %v3638_v32  ;;  %v4449_v24 = vld [vmem:[#allocation2 + $0x1d4] sm:$0xf0] }
  0x57   :  { %1420 = vmatpush.bf16.msrb.mxu2 %v3721_v38  ;;  %1383 = vmatpush.bf16.msra.mxu0 %v3305_v53  ;;  %v4490_v37 = vld [vmem:[#allocation2 + $0x324] sm:$0xf]  ;;  %v3366_v38 = vld [vmem:[#allocation2 + $0x330] sm:$0xf0]  ;;  %v3241_v46 = vor.u32 %v4458_v33, %v3238_v36  ;;  %v3052_v26 = vld [vmem:[#allocation2 + $0xa8] sm:$0xf]  ;;  %v3197_v32 = vor.u32 %v4449_v24, %v3196_v23 }
  0x58   :  { %1396 = vmatpush.bf16.msra.mxu1 %v3433_v54  ;;  %v4522_v39 = vld [vmem:[#allocation2 + $0x424] sm:$0xf]  ;;  %v3622_v43 = vld [vmem:[#allocation2 + $0x530] sm:$0xf0]  ;;  %v3369_v47 = vor.u32 %v4490_v37, %v3366_v38  ;;  %v4477_v31 = vld [vmem:[#allocation2 + $0x2b4] sm:$0xf0] }
  0x59   :  { %v4554_v42 = vld [vmem:[#allocation2 + $0x524] sm:$0xf]  ;;  %v3222_v48 = vld [vmem:[#allocation2 + $0x210] sm:$0xf0]  ;;  %v3436_v33 = vld [vmem:[#allocation2 + $0x3a8] sm:$0xf] }
  0x5a   :  { %1409 = vmatpush.bf16.msra.mxu3 %v3561_v60  ;;  %v4454_v44 = vld [vmem:[#allocation2 + $0x204] sm:$0xf]  ;;  %v3350_v50 = vld [vmem:[#allocation2 + $0x310] sm:$0xf0]  ;;  %v3625_v60 = vor.u32 %v4554_v42, %v3622_v43  ;;  %v3180_v37 = vld [vmem:[#allocation2 + $0x1a8] sm:$0xf] }
  0x5b   :  { %1421 = vmatpush.bf16.msrb.mxu2 %v3705_v52  ;;  %1384 = vmatpush.bf16.msra.mxu0 %v3289_v3  ;;  %v4486_v49 = vld [vmem:[#allocation2 + $0x304] sm:$0xf]  ;;  %v3497_v52 = vor.u32 %v4522_v39, %v3494_v40  ;;  %v3478_v54 = vld [vmem:[#allocation2 + $0x410] sm:$0xf0]  ;;  %v3225_v0 = vor.u32 %v4454_v44, %v3222_v48  ;;  %v4445_v38 = vld [vmem:[#allocation2 + $0x1b4] sm:$0xf0] }
  0x5c   :  { %1397 = vmatpush.bf16.msra.mxu1 %v3417_v4  ;;  %v4518_v53 = vld [vmem:[#allocation2 + $0x404] sm:$0xf]  ;;  %v3734_v61 = vld [vmem:[#allocation2 + $0x610] sm:$0xf0]  ;;  %v3353_v1 = vor.u32 %v4486_v49, %v3350_v50  ;;  %v3036_v40 = vld [vmem:[#allocation2 + $0x88] sm:$0xf] }
  0x5d   :  { %v4582_v59 = vld [vmem:[#allocation2 + $0x604] sm:$0xf]  ;;  %v3606_v3 = vld [vmem:[#allocation2 + $0x510] sm:$0xf0]  ;;  %v3481_v4 = vor.u32 %v4518_v53, %v3478_v54  ;;  %v3292_v43 = vld [vmem:[#allocation2 + $0x288] sm:$0xf] }
  0x5e   :  { %1410 = vmatpush.bf16.msra.mxu3 %v3545_v9  ;;  %v3737_v9 = vor.u32 %v4582_v59, %v3734_v61  ;;  %v4473_v44 = vld [vmem:[#allocation2 + $0x294] sm:$0xf0]  ;;  %v3164_v50 = vld [vmem:[#allocation2 + $0x188] sm:$0xf] }
  0x5f   :  { %1422 = vmatpush.bf16.msrb.mxu2 %v3689_v2  ;;  %1385 = vmatpush.bf16.msra.mxu0 %v3273_v16  ;;  %v4550_v2 = vld [vmem:[#allocation2 + $0x504] sm:$0xf]  ;;  %v3469_v16 = vor.u32 %v4517_v8, %v3468_v6  ;;  %v4505_v48 = vld [vmem:[#allocation2 + $0x394] sm:$0xf0]  ;;  %v3293_v53 = vor.u32 %v4473_v44, %v3292_v43  ;;  %v3020_v54 = vld [vmem:[#allocation2 + $0x68] sm:$0xf] }
  0x60   :  { %1398 = vmatpush.bf16.msra.mxu1 %v3401_v17  ;;  %v3609_v13 = vor.u32 %v4550_v2, %v3606_v3  ;;  %v3324_v17 = vld [vmem:[#allocation2 + $0x2c8] sm:$0xf]  ;;  %v4405_v56 = vld [vmem:[#allocation2 + $0x74] sm:$0xf0] }
  0x61   :  { %v3325_v25 = vor.u32 %v4481_v18, %v3324_v17  ;;  %v3276_v59 = vld [vmem:[#allocation2 + $0x268] sm:$0xf]  ;;  %v4501_v63 = vld [vmem:[#allocation2 + $0x374] sm:$0xf0] }
  0x62   :  { %1411 = vmatpush.bf16.msra.mxu3 %v3529_v21  ;;  %v4513_v21 = vld [vmem:[#allocation2 + $0x3d4] sm:$0xf0]  ;;  %v3404_v62 = vld [vmem:[#allocation2 + $0x368] sm:$0xf] }
  0x63   :  { %1423 = vmatpush.bf16.msrb.mxu2 %v3673_v15  ;;  %1386 = vmatpush.bf16.msra.mxu0 %v3257_v28  ;;  %v4417_v15 = vld [vmem:[#allocation2 + $0xd4] sm:$0xf0]  ;;  %v3453_v28 = vor.u32 %v4513_v21, %v3452_v20  ;;  %v3405_v6 = vor.u32 %v4501_v63, %v3404_v62  ;;  %v3260_v8 = vld [vmem:[#allocation2 + $0x248] sm:$0xf] }
  0x64   :  { %1399 = vmatpush.bf16.msra.mxu1 %v3385_v29  ;;  %v3069_v22 = vor.u32 %v4417_v15, %v3068_v14  ;;  %v3308_v29 = vld [vmem:[#allocation2 + $0x2a8] sm:$0xf]  ;;  %v4437_v2 = vld [vmem:[#allocation2 + $0x174] sm:$0xf0] }
  0x65   :  { %v3309_v39 = vor.u32 %v4477_v31, %v3308_v29  ;;  %v3388_v11 = vld [vmem:[#allocation2 + $0x348] sm:$0xf]  ;;  %v4433_v15 = vld [vmem:[#allocation2 + $0x154] sm:$0xf0] }
  0x66   :  { %1412 = vmatpush.bf16.msra.mxu3 %v3513_v34  ;;  %v4509_v34 = vld [vmem:[#allocation2 + $0x3b4] sm:$0xf0]  ;;  %v3132_v14 = vld [vmem:[#allocation2 + $0x148] sm:$0xf] }
  0x67   :  { %1424 = vmatpush.bf16.msrb.mxu2 %v3657_v27  ;;  %1387 = vmatpush.bf16.msra.mxu0 %v3241_v46  ;;  %v4413_v27 = vld [vmem:[#allocation2 + $0xb4] sm:$0xf0]  ;;  %v3437_v42 = vor.u32 %v4509_v34, %v3436_v33  ;;  %v3181_v46 = vor.u32 %v4445_v38, %v3180_v37  ;;  %v2988_v17 = vld [vmem:[#allocation2 + $0x28] sm:$0xf] }
  0x68   :  { %1400 = vmatpush.bf16.msra.mxu1 %v3369_v47  ;;  %v3053_v36 = vor.u32 %v4413_v27, %v3052_v26  ;;  %v3420_v47 = vld [vmem:[#allocation2 + $0x388] sm:$0xf]  ;;  %v4397_v18 = vld [vmem:[#allocation2 + $0x34] sm:$0xf0] }
  0x69   :  { %v3421_v58 = vor.u32 %v4505_v48, %v3420_v47  ;;  %v3244_v20 = vld [vmem:[#allocation2 + $0x228] sm:$0xf]  ;;  %v4461_v21 = vld [vmem:[#allocation2 + $0x234] sm:$0xf0]  ;;  %v4419_v47 = vld [vmem:[#allocation2 + $0xec] sm:$0xf] }
  0x6a   :  { %1413 = vmatpush.bf16.msra.mxu3 %v3497_v52  ;;  %v4441_v52 = vld [vmem:[#allocation2 + $0x194] sm:$0xf0]  ;;  %v3372_v23 = vld [vmem:[#allocation2 + $0x328] sm:$0xf]  ;;  %v3245_v29 = vor.u32 %v4461_v21, %v3244_v20  ;;  %v3086_v48 = vld [vmem:[#allocation2 + $0xf8] sm:$0xf0] }
  0x6b   :  { %1425 = vmatpush.bf16.msrb.mxu2 %v3641_v41  ;;  %1388 = vmatpush.bf16.msra.mxu0 %v3225_v0  ;;  %v4409_v41 = vld [vmem:[#allocation2 + $0x94] sm:$0xf0]  ;;  %v3165_v61 = vor.u32 %v4441_v52, %v3164_v50  ;;  %v3021_v0 = vor.u32 %v4405_v56, %v3020_v54  ;;  %v3116_v26 = vld [vmem:[#allocation2 + $0x128] sm:$0xf]  ;;  %v3089_v63 = vor.u32 %v4419_v47, %v3086_v48 }
  0x6c   :  { %1401 = vmatpush.bf16.msra.mxu1 %v3353_v1  ;;  %v3037_v49 = vor.u32 %v4409_v41, %v3036_v40  ;;  %v3148_v1 = vld [vmem:[#allocation2 + $0x168] sm:$0xf]  ;;  %v4493_v24 = vld [vmem:[#allocation2 + $0x334] sm:$0xf0] }
  0x6d   :  { %v3149_v10 = vor.u32 %v4437_v2, %v3148_v1  ;;  %v4429_v27 = vld [vmem:[#allocation2 + $0x134] sm:$0xf0]  ;;  %v3373_v34 = vor.u32 %v4493_v24, %v3372_v23  ;;  %v3228_v37 = vld [vmem:[#allocation2 + $0x208] sm:$0xf]  ;;  %v4415_v1 = vld [vmem:[#allocation2 + $0xcc] sm:$0xf] }
  0x6e   :  { %1414 = vmatpush.bf16.msra.mxu3 %v3481_v4  ;;  %1389 = vmatmul.bf16.vlgmr.msra.gmra.mxu0 %v4890_v51  ;;  %v3004_v4 = vld [vmem:[#allocation2 + $0x48] sm:$0xf]  ;;  %v4393_v31 = vld [vmem:[#allocation2 + $0x14] sm:$0xf0]  ;;  %v3117_v40 = vor.u32 %v4429_v27, %v3116_v26  ;;  %v3070_v2 = vld [vmem:[#allocation2 + $0xd8] sm:$0xf0] }
  0x6f   :  { %1426 = vmatpush.bf16.msrb.mxu2 %v3625_v60  ;;  %1472 = vmatpush.bf16.msrb.mxu0 %v3341_v12  ;;  %v4469_v60 = vld [vmem:[#allocation2 + $0x274] sm:$0xf0]  ;;  %v3724_v52 = vld [vmem:[#allocation2 + $0x5e8] sm:$0xf]  ;;  %v3182_v23 = vld [vmem:[#allocation2 + $0x1b8] sm:$0xf0] }
  0x70   :  { %1446 = vmatpush.bf16.msrb.mxu1 %v3085_v5  ;;  %v3277_v3 = vor.u32 %v4469_v60, %v3276_v59  ;;  %v4401_v5 = vld [vmem:[#allocation2 + $0x54] sm:$0xf0]  ;;  %v3580_v54 = vld [vmem:[#allocation2 + $0x4c8] sm:$0xf]  ;;  %v4451_v60 = vld [vmem:[#allocation2 + $0x1ec] sm:$0xf] }
  0x71   :  { %1415 = vmatmul.bf16.vlgmr.msra.gmra.mxu3 %v4918_v30  ;;  %1402 = vmatmul.bf16.vlgmr.msra.gmra.mxu1 %v4894_v57  ;;  %v4497_v12 = vld [vmem:[#allocation2 + $0x354] sm:$0xf0]  ;;  %v3548_v20 = vld [vmem:[#allocation2 + $0x488] sm:$0xf]  ;;  %v4407_v26 = vld [vmem:[#allocation2 + $0x8c] sm:$0xf] }
  0x72   :  { %1440 = vmatpush.bf16.msrb.mxu3 %v3737_v9  ;;  %v4465_v9 = vld [vmem:[#allocation2 + $0x254] sm:$0xf0]  ;;  %v3038_v27 = vld [vmem:[#allocation2 + $0x98] sm:$0xf0]  ;;  %v3516_v47 = vld [vmem:[#allocation2 + $0x448] sm:$0xf] }
  0x73   :  { %1427 = vmatpush.bf16.msrb.mxu2 %v3609_v13  ;;  %1473 = vmatpush.bf16.msrb.mxu0 %v3325_v25  ;;  %v3005_v13 = vor.u32 %v4401_v5, %v3004_v4  ;;  %v2989_v25 = vor.u32 %v4397_v18, %v2988_v17  ;;  %v4549_v33 = vld [vmem:[#allocation2 + $0x4f4] sm:$0xf0]  ;;  %v3708_v5 = vld [vmem:[#allocation2 + $0x5c8] sm:$0xf] }
  0x74   :  { %1447 = vmatpush.bf16.msrb.mxu1 %v3069_v22  ;;  %v3133_v22 = vor.u32 %v4433_v15, %v3132_v14  ;;  %v4457_v38 = vld [vmem:[#allocation2 + $0x214] sm:$0xf0]  ;;  %v4411_v14 = vld [vmem:[#allocation2 + $0xac] sm:$0xf]  ;;  %v3054_v15 = vld [vmem:[#allocation2 + $0xb8] sm:$0xf0] }
  0x75   :  { %v4489_v41 = vld [vmem:[#allocation2 + $0x314] sm:$0xf0]  ;;  %v3229_v50 = vor.u32 %v4457_v38, %v3228_v37  ;;  %v3692_v18 = vld [vmem:[#allocation2 + $0x5a8] sm:$0xf]  ;;  %v3057_v24 = vor.u32 %v4411_v14, %v3054_v15  ;;  %v3166_v37 = vld [vmem:[#allocation2 + $0x198] sm:$0xf0]  ;;  %v3041_v38 = vor.u32 %v4407_v26, %v3038_v27 }
  0x76   :  { %1459 = vmatpush.bf16.msra.mxu3 %v3213_v19  ;;  %1428 = vmatmul.bf16.vlgmr.msrb.gmra.mxu2 %v4920_v35  ;;  %v3389_v19 = vor.u32 %v4497_v12, %v3388_v11  ;;  %v4585_v43 = vld [vmem:[#allocation2 + $0x614] sm:$0xf0]  ;;  %v3198_v11 = vld [vmem:[#allocation2 + $0x1d8] sm:$0xf0]  ;;  %v3073_v12 = vor.u32 %v4415_v1, %v3070_v2 }
  0x77   :  { %1485 = vmatpush.bf16.msra.mxu2 %v3469_v16  ;;  %1474 = vmatpush.bf16.msrb.mxu0 %v3309_v39  ;;  %v3261_v16 = vor.u32 %v4465_v9, %v3260_v8  ;;  %v3356_v39 = vld [vmem:[#allocation2 + $0x308] sm:$0xf]  ;;  %v4541_v9 = vld [vmem:[#allocation2 + $0x4b4] sm:$0xf0]  ;;  %v3134_v1 = vld [vmem:[#allocation2 + $0x158] sm:$0xf0] }
  0x78   :  { %1448 = vmatpush.bf16.msrb.mxu1 %v3053_v36  ;;  %v3100_v36 = vld [vmem:[#allocation2 + $0x108] sm:$0xf]  ;;  %v3357_v56 = vor.u32 %v4489_v41, %v3356_v39  ;;  %v4537_v21 = vld [vmem:[#allocation2 + $0x494] sm:$0xf0]  ;;  %v3022_v41 = vld [vmem:[#allocation2 + $0x78] sm:$0xf0] }
  0x79   :  { %v3564_v8 = vld [vmem:[#allocation2 + $0x4a8] sm:$0xf]  ;;  %v4529_v48 = vld [vmem:[#allocation2 + $0x454] sm:$0xf0]  ;;  %v3118_v14 = vld [vmem:[#allocation2 + $0x138] sm:$0xf0] }
  0x7a   :  { %1460 = vmatpush.bf16.msra.mxu3 %v3197_v32  ;;  %v3596_v32 = vld [vmem:[#allocation2 + $0x4e8] sm:$0xf]  ;;  %v3470_v26 = vld [vmem:[#allocation2 + $0x3f8] sm:$0xf0] }
  0x7b   :  { %1486 = vmatpush.bf16.msra.mxu2 %v3453_v28  ;;  %1475 = vmatpush.bf16.msrb.mxu0 %v3293_v53  ;;  %v2972_v28 = vld [vmem:[#allocation2 + $0x8] sm:$0xf]  ;;  %v4581_v53 = vld [vmem:[#allocation2 + $0x5f4] sm:$0xf0] }
  0x7c   :  { %1449 = vmatpush.bf16.msrb.mxu1 %v3037_v49  ;;  %v2973_v44 = vor.u32 %v4393_v31, %v2972_v28  ;;  %v3597_v49 = vor.u32 %v4549_v33, %v3596_v32  ;;  %v3549_v28 = vor.u32 %v4537_v21, %v3548_v20  ;;  %v3676_v31 = vld [vmem:[#allocation2 + $0x588] sm:$0xf]  ;;  %v4569_v32 = vld [vmem:[#allocation2 + $0x594] sm:$0xf0]  ;;  %v4391_v20 = vld [vmem:[#allocation2 + $0xc] sm:$0xf] }
  0x7d   :  { %v3532_v33 = vld [vmem:[#allocation2 + $0x468] sm:$0xf]  ;;  %v3677_v39 = vor.u32 %v4569_v32, %v3676_v31  ;;  %v2974_v21 = vld [vmem:[#allocation2 + $0x18] sm:$0xf0]  ;;  %v4479_v31 = vld [vmem:[#allocation2 + $0x2cc] sm:$0xf] }
  0x7e   :  { %1461 = vmatpush.bf16.msra.mxu3 %v3181_v46  ;;  %v4425_v46 = vld [vmem:[#allocation2 + $0x114] sm:$0xf0]  ;;  %v2977_v32 = vor.u32 %v4391_v20, %v2974_v21  ;;  %v4499_v20 = vld [vmem:[#allocation2 + $0x36c] sm:$0xf] }
  0x7f   :  { %1487 = vmatpush.bf16.msra.mxu2 %v3437_v42  ;;  %1476 = vmatpush.bf16.msrb.mxu0 %v3277_v3  ;;  %v3740_v42 = vld [vmem:[#allocation2 + $0x608] sm:$0xf]  ;;  %v3101_v62 = vor.u32 %v4425_v46, %v3100_v36  ;;  %v4439_v36 = vld [vmem:[#allocation2 + $0x18c] sm:$0xf]  ;;  %v4565_v46 = vld [vmem:[#allocation2 + $0x574] sm:$0xf0] }
  0x80   :  { %1450 = vmatpush.bf16.msrb.mxu1 %v3021_v0  ;;  %v3741_v59 = vor.u32 %v4585_v43, %v3740_v42  ;;  %v3725_v0 = vor.u32 %v4581_v53, %v3724_v52  ;;  %v3169_v43 = vor.u32 %v4439_v36, %v3166_v37  ;;  %v3102_v36 = vld [vmem:[#allocation2 + $0x118] sm:$0xf0] }
  0x81   :  { %3747 = vmatmul.msk.bf16.vlgmr.msrb.gmra.mxu3 %vm1260_vm0, %v4908_v45 }
  0x82   :  { %1462 = vmatpush.bf16.msra.mxu3 %v3165_v61  ;;  %v3214_v61 = vld [vmem:[#allocation2 + $0x1f8] sm:$0xf0] }
  0x83   :  { %1488 = vmatpush.bf16.msra.mxu2 %v3421_v58  ;;  %1477 = vmatpush.bf16.msrb.mxu0 %v3261_v16  ;;  %v4545_v58 = vld [vmem:[#allocation2 + $0x4d4] sm:$0xf0]  ;;  %v3217_v4 = vor.u32 %v4451_v60, %v3214_v61  ;;  %v3565_v16 = vor.u32 %v4541_v9, %v3564_v8  ;;  %v3644_v60 = vld [vmem:[#allocation2 + $0x548] sm:$0xf] }
  0x84   :  { %1451 = vmatpush.bf16.msrb.mxu1 %v3005_v13  ;;  %v3581_v3 = vor.u32 %v4545_v58, %v3580_v54  ;;  %v4399_v54 = vld [vmem:[#allocation2 + $0x4c] sm:$0xf]  ;;  %v3517_v58 = vor.u32 %v4529_v48, %v3516_v47  ;;  %v4561_v61 = vld [vmem:[#allocation2 + $0x554] sm:$0xf0]  ;;  %v3628_v9 = vld [vmem:[#allocation2 + $0x528] sm:$0xf] }
  0x85   :  { %v4543_v47 = vld [vmem:[#allocation2 + $0x4cc] sm:$0xf]  ;;  %v3582_v48 = vld [vmem:[#allocation2 + $0x4d8] sm:$0xf0] }
  0x86   :  { %1463 = vmatpush.bf16.msra.mxu3 %v3149_v10  ;;  %v4447_v10 = vld [vmem:[#allocation2 + $0x1cc] sm:$0xf] }
  0x87   :  { %1489 = vmatpush.bf16.msra.mxu2 %v3405_v6  ;;  %1478 = vmatpush.bf16.msrb.mxu0 %v3245_v29  ;;  %v4577_v6 = vld [vmem:[#allocation2 + $0x5d4] sm:$0xf0]  ;;  %v3201_v17 = vor.u32 %v4447_v10, %v3198_v11  ;;  %v3484_v11 = vld [vmem:[#allocation2 + $0x408] sm:$0xf] }
  0x88   :  { %1452 = vmatpush.bf16.msrb.mxu1 %v2989_v25  ;;  %v3709_v13 = vor.u32 %v4577_v6, %v3708_v5  ;;  %v2990_v5 = vld [vmem:[#allocation2 + $0x38] sm:$0xf0]  ;;  %v4557_v10 = vld [vmem:[#allocation2 + $0x534] sm:$0xf0] }
  0x8a   :  { %1464 = vmatpush.bf16.msra.mxu3 %v3133_v22  ;;  %v4443_v22 = vld [vmem:[#allocation2 + $0x1ac] sm:$0xf] }
  0x8b   :  { %1490 = vmatpush.bf16.msra.mxu2 %v3389_v19  ;;  %1479 = vmatpush.bf16.msrb.mxu0 %v3229_v50  ;;  %v4573_v19 = vld [vmem:[#allocation2 + $0x5b4] sm:$0xf0]  ;;  %v3185_v29 = vor.u32 %v4443_v22, %v3182_v23  ;;  %v3150_v50 = vld [vmem:[#allocation2 + $0x178] sm:$0xf0] }
  0x8c   :  { %1453 = vmatpush.bf16.msrb.mxu1 %v2973_v44  ;;  %v3693_v25 = vor.u32 %v4573_v19, %v3692_v18  ;;  %v3660_v44 = vld [vmem:[#allocation2 + $0x568] sm:$0xf]  ;;  %v3629_v18 = vor.u32 %v4557_v10, %v3628_v9  ;;  %v3422_v10 = vld [vmem:[#allocation2 + $0x398] sm:$0xf0] }
  0x8d   :  { %v3661_v53 = vor.u32 %v4565_v46, %v3660_v44  ;;  %v3612_v19 = vld [vmem:[#allocation2 + $0x508] sm:$0xf]  ;;  %v3454_v46 = vld [vmem:[#allocation2 + $0x3d8] sm:$0xf0] }
  0x8e   :  { %1465 = vmatpush.bf16.msra.mxu3 %v3117_v40  ;;  %1480 = vmatmul.bf16.vlgmr.msrb.gmra.mxu0 %v4890_v51  ;;  %v4403_v40 = vld [vmem:[#allocation2 + $0x6c] sm:$0xf] }
  0x8f   :  { %1491 = vmatpush.bf16.msra.mxu2 %v3373_v34  ;;  %1531 = vmatpush.bf16.msra.mxu0 %v3741_v59  ;;  %v4533_v34 = vld [vmem:[#allocation2 + $0x474] sm:$0xf0]  ;;  %v3025_v52 = vor.u32 %v4403_v40, %v3022_v41 }
  0x90   :  { %1498 = vmatpush.bf16.msra.mxu1 %v3597_v49  ;;  %v3533_v42 = vor.u32 %v4533_v34, %v3532_v33  ;;  %v4435_v49 = vld [vmem:[#allocation2 + $0x16c] sm:$0xf]  ;;  %v3326_v33 = vld [vmem:[#allocation2 + $0x2d8] sm:$0xf0] }
  0x91   :  { %1454 = vmatmul.bf16.vlgmr.msrb.gmra.mxu1 %v4892_v55  ;;  %v3153_v59 = vor.u32 %v4435_v49, %v3150_v50  ;;  %v4423_v34 = vld [vmem:[#allocation2 + $0x10c] sm:$0xf] }
  0x92   :  { %1466 = vmatpush.bf16.msra.mxu3 %v3101_v62  ;;  %v3500_v62 = vld [vmem:[#allocation2 + $0x428] sm:$0xf]  ;;  %v3105_v44 = vor.u32 %v4423_v34, %v3102_v36  ;;  %v4475_v50 = vld [vmem:[#allocation2 + $0x2ac] sm:$0xf] }
  0x93   :  { %1492 = vmatpush.bf16.msra.mxu2 %v3357_v56  ;;  %1550 = vmatpush.bf16.msrb.mxu0 %v3217_v4  ;;  %v3006_v56 = vld [vmem:[#allocation2 + $0x58] sm:$0xf0]  ;;  %v4395_v4 = vld [vmem:[#allocation2 + $0x2c] sm:$0xf] }
  0x94   :  { %1499 = vmatpush.bf16.msra.mxu1 %v3581_v3  ;;  %v3009_v2 = vor.u32 %v4399_v54, %v3006_v56  ;;  %v3645_v3 = vor.u32 %v4561_v61, %v3644_v60  ;;  %v2993_v15 = vor.u32 %v4395_v4, %v2990_v5  ;;  %v3710_v54 = vld [vmem:[#allocation2 + $0x5d8] sm:$0xf0]  ;;  %v4495_v34 = vld [vmem:[#allocation2 + $0x34c] sm:$0xf] }
  0x95   :  { %1467 = vmatmul.bf16.vlgmr.msra.gmra.mxu3 %v4901_v7  ;;  %v3438_v61 = vld [vmem:[#allocation2 + $0x3b8] sm:$0xf0] }
  0x96   :  { %1511 = vmatpush.bf16.msrb.mxu3 %v3725_v0  ;;  %1493 = vmatmul.bf16.vlgmr.msra.gmra.mxu2 %v4894_v57  ;;  %v4431_v0 = vld [vmem:[#allocation2 + $0x14c] sm:$0xf]  ;;  %v3694_v4 = vld [vmem:[#allocation2 + $0x5b8] sm:$0xf0] }
  0x97   :  { %1537 = vmatpush.bf16.msrb.mxu2 %v3089_v63  ;;  %1551 = vmatpush.bf16.msrb.mxu0 %v3201_v17  ;;  %v4525_v63 = vld [vmem:[#allocation2 + $0x434] sm:$0xf0]  ;;  %v3137_v8 = vor.u32 %v4431_v0, %v3134_v1  ;;  %v3342_v17 = vld [vmem:[#allocation2 + $0x2f8] sm:$0xf0]  ;;  %v4471_v1 = vld [vmem:[#allocation2 + $0x28c] sm:$0xf] }
  0x98   :  { %1500 = vmatpush.bf16.msra.mxu1 %v3565_v16  ;;  %v3501_v6 = vor.u32 %v4525_v63, %v3500_v62  ;;  %v4483_v16 = vld [vmem:[#allocation2 + $0x2ec] sm:$0xf]  ;;  %v3566_v63 = vld [vmem:[#allocation2 + $0x4b8] sm:$0xf0] }
  0x99   :  { %v3345_v27 = vor.u32 %v4483_v16, %v3342_v17  ;;  %v4539_v62 = vld [vmem:[#allocation2 + $0x4ac] sm:$0xf]  ;;  %v3678_v17 = vld [vmem:[#allocation2 + $0x598] sm:$0xf0] }
  0x9a   :  { %1512 = vmatpush.bf16.msrb.mxu3 %v3709_v13  ;;  %v4427_v13 = vld [vmem:[#allocation2 + $0x12c] sm:$0xf] }
  0x9b   :  { %1538 = vmatpush.bf16.msrb.mxu2 %v3073_v12  ;;  %1552 = vmatpush.bf16.msrb.mxu0 %v3185_v29  ;;  %v4521_v12 = vld [vmem:[#allocation2 + $0x414] sm:$0xf0]  ;;  %v3121_v23 = vor.u32 %v4427_v13, %v3118_v14  ;;  %v3598_v29 = vld [vmem:[#allocation2 + $0x4f8] sm:$0xf0]  ;;  %v4467_v14 = vld [vmem:[#allocation2 + $0x26c] sm:$0xf] }
  0x9c   :  { %1501 = vmatpush.bf16.msra.mxu1 %v3549_v28  ;;  %v3485_v22 = vor.u32 %v4521_v12, %v3484_v11  ;;  %v4547_v28 = vld [vmem:[#allocation2 + $0x4ec] sm:$0xf]  ;;  %v3550_v12 = vld [vmem:[#allocation2 + $0x498] sm:$0xf0] }
  0x9d   :  { %v3601_v41 = vor.u32 %v4547_v28, %v3598_v29  ;;  %v4535_v11 = vld [vmem:[#allocation2 + $0x48c] sm:$0xf]  ;;  %v3662_v29 = vld [vmem:[#allocation2 + $0x578] sm:$0xf0] }
  0x9e   :  { %1513 = vmatpush.bf16.msrb.mxu3 %v3693_v25  ;;  %3748 = vmatmul.msk.bf16.vlgmr.msra.gmra.mxu0 %vm1260_vm0, %v4908_v45  ;;  %v4515_v25 = vld [vmem:[#allocation2 + $0x3ec] sm:$0xf] }
  0x9f   :  { %1539 = vmatpush.bf16.msrb.mxu2 %v3057_v24  ;;  %1553 = vmatpush.bf16.msrb.mxu0 %v3169_v43  ;;  %v4553_v24 = vld [vmem:[#allocation2 + $0x514] sm:$0xf0]  ;;  %v3473_v40 = vor.u32 %v4515_v25, %v3470_v26  ;;  %v3329_v43 = vor.u32 %v4479_v31, %v3326_v33  ;;  %v4463_v26 = vld [vmem:[#allocation2 + $0x24c] sm:$0xf] }
  0xa0   :  { %1502 = vmatpush.bf16.msra.mxu1 %v3533_v42  ;;  %v3613_v37 = vor.u32 %v4553_v24, %v3612_v19  ;;  %v4511_v42 = vld [vmem:[#allocation2 + $0x3cc] sm:$0xf]  ;;  %v3553_v19 = vor.u32 %v4535_v11, %v3550_v12  ;;  %v3534_v24 = vld [vmem:[#allocation2 + $0x478] sm:$0xf0] }
  0xa1   :  { %v3457_v56 = vor.u32 %v4511_v42, %v3454_v46  ;;  %v4563_v28 = vld [vmem:[#allocation2 + $0x56c] sm:$0xf]  ;;  %v3486_v11 = vld [vmem:[#allocation2 + $0x418] sm:$0xf0] }
  0xa2   :  { %1514 = vmatpush.bf16.msrb.mxu3 %v3677_v39  ;;  %v3726_v39 = vld [vmem:[#allocation2 + $0x5f8] sm:$0xf0]  ;;  %v4459_v42 = vld [vmem:[#allocation2 + $0x22c] sm:$0xf] }
  0xa3   :  { %1540 = vmatpush.bf16.msrb.mxu2 %v3041_v38  ;;  %1554 = vmatpush.bf16.msrb.mxu0 %v3153_v59  ;;  %v4579_v38 = vld [vmem:[#allocation2 + $0x5ec] sm:$0xf] }
  0xa4   :  { %1503 = vmatpush.bf16.msra.mxu1 %v3517_v58  ;;  %v3729_v49 = vor.u32 %v4579_v38, %v3726_v39  ;;  %v3585_v58 = vor.u32 %v4543_v47, %v3582_v48  ;;  %v4507_v59 = vld [vmem:[#allocation2 + $0x3ac] sm:$0xf]  ;;  %v3390_v38 = vld [vmem:[#allocation2 + $0x358] sm:$0xf0] }
  0xa5   :  { %v3441_v5 = vor.u32 %v4507_v59, %v3438_v61  ;;  %v4527_v39 = vld [vmem:[#allocation2 + $0x44c] sm:$0xf]  ;;  %v3646_v47 = vld [vmem:[#allocation2 + $0x558] sm:$0xf0]  ;;  %v3393_v48 = vor.u32 %v4495_v34, %v3390_v38  ;;  %v3832_v38 = vld [vmem:[#allocation5 + $0xa0] sm:$0xf] }
  0xa6   :  { %1515 = vmatpush.bf16.msrb.mxu3 %v3661_v53  ;;  %v4575_v53 = vld [vmem:[#allocation2 + $0x5cc] sm:$0xf] }
  0xa7   :  { %1541 = vmatpush.bf16.msrb.mxu2 %v3025_v52  ;;  %1555 = vmatpush.bf16.msrb.mxu0 %v3137_v8  ;;  %v3310_v52 = vld [vmem:[#allocation2 + $0x2b8] sm:$0xf0]  ;;  %v3713_v0 = vor.u32 %v4575_v53, %v3710_v54  ;;  %v4503_v8 = vld [vmem:[#allocation2 + $0x38c] sm:$0xf] }
  0xa8   :  { %1504 = vmatpush.bf16.msra.mxu1 %v3501_v6  ;;  %v3313_v60 = vor.u32 %v4475_v50, %v3310_v52  ;;  %v3569_v6 = vor.u32 %v4539_v62, %v3566_v63  ;;  %v4559_v46 = vld [vmem:[#allocation2 + $0x54c] sm:$0xf]  ;;  %v3374_v53 = vld [vmem:[#allocation2 + $0x338] sm:$0xf0] }
  0xa9   :  { %v4491_v50 = vld [vmem:[#allocation2 + $0x32c] sm:$0xf]  ;;  %v3630_v63 = vld [vmem:[#allocation2 + $0x538] sm:$0xf0] }
  0xaa   :  { %1516 = vmatpush.bf16.msrb.mxu3 %v3645_v3  ;;  %v4571_v3 = vld [vmem:[#allocation2 + $0x5ac] sm:$0xf] }
  0xab   :  { %1542 = vmatpush.bf16.msrb.mxu2 %v3009_v2  ;;  %1556 = vmatpush.bf16.msrb.mxu0 %v3121_v23  ;;  %v3294_v2 = vld [vmem:[#allocation2 + $0x298] sm:$0xf0]  ;;  %v3697_v13 = vor.u32 %v4571_v3, %v3694_v4  ;;  %v4531_v23 = vld [vmem:[#allocation2 + $0x46c] sm:$0xf]  ;;  %v3377_v4 = vor.u32 %v4491_v50, %v3374_v53 }
  0xac   :  { %1505 = vmatpush.bf16.msra.mxu1 %v3485_v22  ;;  %v3297_v9 = vor.u32 %v4471_v1, %v3294_v2  ;;  %v3406_v22 = vld [vmem:[#allocation2 + $0x378] sm:$0xf0]  ;;  %v4944_v25 = vpop.f32.mrf.mxu1  ;;  %v3537_v33 = vor.u32 %v4531_v23, %v3534_v24  ;;  %v4523_v54 = vld [vmem:[#allocation2 + $0x42c] sm:$0xf]  ;;  %v4953_v2 = vld [vmem:[%s5145_s2] sm:$0xf] }
  0xad   :  { %v4455_v59 = vld [vmem:[#allocation2 + $0x20c] sm:$0xf]  ;;  %v3742_v1 = vld [vmem:[#allocation2 + $0x618] sm:$0xf0] }
  0xae   :  { %1517 = vmatpush.bf16.msrb.mxu3 %v3629_v18  ;;  %v3425_v18 = vor.u32 %v4503_v8, %v3422_v10  ;;  %v4555_v61 = vld [vmem:[#allocation2 + $0x52c] sm:$0xf] }
  0xaf   :  { %1543 = vmatpush.bf16.msrb.mxu2 %v2993_v15  ;;  %1506 = vmatmul.bf16.vlgmr.msra.gmra.mxu1 %v4918_v30  ;;  %v3278_v15 = vld [vmem:[#allocation2 + $0x278] sm:$0xf0]  ;;  %v4942_v16 = vpop.f32.mrf.mxu0  ;;  %v4519_v10 = vld [vmem:[#allocation2 + $0x40c] sm:$0xf] }
  0xb0   :  { %1563 = vmatpush.bf16.msrb.mxu1 %v3345_v27  ;;  %1557 = vmatpush.bf16.msrb.mxu0 %v3105_v44  ;;  %v3281_v21 = vor.u32 %v4467_v14, %v3278_v15  ;;  %v3262_v27 = vld [vmem:[#allocation2 + $0x258] sm:$0xf0]  ;;  %v3864_v14 = vld [vmem:[#allocation5 + $0xe0] sm:$0xf]  ;;  %v4616_v15 = vld [vmem:[#allocation5 + $0xec] sm:$0xf0]  ;;  %v3489_v23 = vor.u32 %v4519_v10, %v3486_v11 }
  0xb1   :  { %v3265_v36 = vor.u32 %v4463_v26, %v3262_v27  ;;  %v3865_v24 = vor.u32 %v4616_v15, %v3864_v14  ;;  %v3848_v26 = vld [vmem:[#allocation5 + $0xc0] sm:$0xf]  ;;  %v4612_v27 = vld [vmem:[#allocation5 + $0xcc] sm:$0xf0] }
  0xb2   :  { %1518 = vmatpush.bf16.msrb.mxu3 %v3613_v37  ;;  %v3896_v11 = vld [vmem:[#allocation5 + $0x120] sm:$0xf]  ;;  %v4588_v15 = vld [vmem:[#allocation5 + $0xc] sm:$0xf0] }
  0xb3   :  { %1544 = vmatpush.bf16.msrb.mxu2 %v2977_v32  ;;  %1558 = vmatmul.bf16.vlgmr.msrb.gmra.mxu0 %v4901_v7  ;;  %v3409_v32 = vor.u32 %v4499_v20, %v3406_v22  ;;  %v4648_v20 = vld [vmem:[#allocation5 + $0x1ec] sm:$0xf0]  ;;  %v3752_v14 = vld [vmem:[#allocation5] sm:$0xf] }
  0xb4   :  { %1564 = vmatpush.bf16.msrb.mxu1 %v3329_v43  ;;  %1602 = vmatpush.bf16.msra.mxu0 %v3729_v49  ;;  %v4946_v31 = vpop.f32.mrf.mxu2  ;;  %v4948_v37 = vpop.f32.mrf.mxu3  ;;  %v3246_v43 = vld [vmem:[#allocation2 + $0x238] sm:$0xf0] }
  0xb5   :  { %1519 = vmatmul.bf16.vlgmr.msrb.gmra.mxu3 %v4920_v35  ;;  %v3249_v52 = vor.u32 %v4459_v42, %v3246_v43  ;;  %v1288_v62 = vpop.f32.mrf.mxu1  ;;  %v4640_v42 = vld [vmem:[#allocation5 + $0x1ac] sm:$0xf0] }
  0xb6   :  { %1576 = vmatpush.bf16.msra.mxu3 %v3473_v40  ;;  %1545 = vmatmul.bf16.vlgmr.msrb.gmra.mxu2 %v4892_v55  ;;  %v4567_v55 = vld [vmem:[#allocation2 + $0x58c] sm:$0xf]  ;;  %v3518_v40 = vld [vmem:[#allocation2 + $0x458] sm:$0xf0]  ;;  %v4596_v62 = vld [vmem:[#allocation5 + $0x4c] sm:$0xf0] }
  0xb7   :  { %1589 = vmatpush.bf16.msra.mxu2 %v3601_v41  ;;  %v3681_v7 = vor.u32 %v4567_v55, %v3678_v17  ;;  %v3665_v41 = vor.u32 %v4563_v28, %v3662_v29  ;;  %v1275_v44 = vpop.f32.mrf.mxu0  ;;  %v3521_v49 = vor.u32 %v4527_v39, %v3518_v40  ;;  %v4551_v55 = vld [vmem:[#allocation2 + $0x50c] sm:$0xf]  ;;  %v3976_v29 = vld [vmem:[#allocation5 + $0x1c0] sm:$0xf]  ;;  %v4608_v39 = vld [vmem:[#allocation5 + $0xac] sm:$0xf0] }
  0xb8   :  { %1565 = vmatpush.bf16.msrb.mxu1 %v3313_v60  ;;  %1603 = vmatpush.bf16.msra.mxu0 %v3713_v0  ;;  %v3230_v60 = vld [vmem:[#allocation2 + $0x218] sm:$0xf0]  ;;  %v4583_v0 = vld [vmem:[#allocation2 + $0x60c] sm:$0xf]  ;;  %v4604_v44 = vld [vmem:[#allocation5 + $0x8c] sm:$0xf0] }
  0xb9   :  { %v3233_v8 = vor.u32 %v4455_v59, %v3230_v60  ;;  %v3745_v17 = vor.u32 %v4583_v0, %v3742_v1  ;;  %v3912_v0 = vld [vmem:[#allocation5 + $0x140] sm:$0xf]  ;;  %v4628_v1 = vld [vmem:[#allocation5 + $0x14c] sm:$0xf0] }
  0xba   :  { %1577 = vmatpush.bf16.msra.mxu3 %v3457_v56  ;;  %v3502_v56 = vld [vmem:[#allocation2 + $0x438] sm:$0xf0]  ;;  %v3913_v10 = vor.u32 %v4628_v1, %v3912_v0  ;;  %v4664_v0 = vld [vmem:[#allocation5 + $0x26c] sm:$0xf0]  ;;  %v273_v1 = vperm.slane %v4953_v2, 1 }
  0xbb   :  { %1590 = vmatpush.bf16.msra.mxu2 %v3585_v58  ;;  %v3649_v58 = vor.u32 %v4559_v46, %v3646_v47 }
  0xbc   :  { %1566 = vmatpush.bf16.msrb.mxu1 %v3297_v9  ;;  %1604 = vmatpush.bf16.msra.mxu0 %v3697_v13  ;;  %v1301_v3 = vpop.f32.mrf.mxu2  ;;  %v3358_v9 = vld [vmem:[#allocation2 + $0x318] sm:$0xf0]  ;;  %v1314_v12 = vpop.f32.mrf.mxu3  ;;  %v3633_v13 = vor.u32 %v4555_v61, %v3630_v63  ;;  %v3784_v61 = vld [vmem:[#allocation5 + $0x40] sm:$0xf] }
  0xbd   :  { %v4624_v12 = vld [vmem:[#allocation5 + $0x12c] sm:$0xf0] }
  0xbe   :  { %1578 = vmatpush.bf16.msra.mxu3 %v3441_v5  ;;  %v3505_v5 = vor.u32 %v4523_v54, %v3502_v56  ;;  %v4600_v54 = vld [vmem:[#allocation5 + $0x6c] sm:$0xf0]  ;;  %v3928_v56 = vld [vmem:[#allocation5 + $0x160] sm:$0xf] }
  0xbf   :  { %1591 = vmatpush.bf16.msra.mxu2 %v3569_v6  ;;  %v4487_v6 = vld [vmem:[#allocation2 + $0x30c] sm:$0xf] }
  0xc0   :  { %1567 = vmatpush.bf16.msrb.mxu1 %v3281_v21  ;;  %1605 = vmatpush.bf16.msra.mxu0 %v3681_v7  ;;  %v272_v21 = vperm.slane %v4953_v2, 0  ;;  %v3361_v22 = vor.u32 %v4487_v6, %v3358_v9  ;;  %v4592_v9 = vld [vmem:[#allocation5 + $0x2c] sm:$0xf0] }
  0xc2   :  { %1579 = vmatpush.bf16.msra.mxu3 %v3425_v18  ;;  %v3614_v18 = vld [vmem:[#allocation2 + $0x518] sm:$0xf0] }
  0xc3   :  { %1592 = vmatpush.bf16.msra.mxu2 %v3553_v19  ;;  %v3992_v19 = vld [vmem:[#allocation5 + $0x1e0] sm:$0xf]  ;;  %v3617_v7 = vor.u32 %v4551_v55, %v3614_v18 }
  0xc4   :  { %1568 = vmatpush.bf16.msrb.mxu1 %v3265_v36  ;;  %1606 = vmatpush.bf16.msra.mxu0 %v3665_v41  ;;  %v3993_v28 = vor.u32 %v4648_v20, %v3992_v19  ;;  %v4958_v34 = vpop.f32.mrf.mxu2  ;;  %v3849_v36 = vor.u32 %v4612_v27, %v3848_v26  ;;  %v3960_v41 = vld [vmem:[#allocation5 + $0x1a0] sm:$0xf]  ;;  %v4680_v19 = vld [vmem:[#allocation5 + $0x2ec] sm:$0xf0]  ;;  %v3994_v26 = vld [vmem:[#allocation5 + $0x1f0] sm:$0xf0]  ;;  %v3753_v27 = vor.u32 %v4588_v15, %v3752_v14 }
  0xc5   :  { %v3961_v46 = vor.u32 %v4640_v42, %v3960_v41  ;;  %v4120_v18 = vld [vmem:[#allocation5 + $0x2e0] sm:$0xf]  ;;  %v4642_v42 = vld [vmem:[#allocation5 + $0x1c4] sm:$0xf] }
  0xc6   :  { %1580 = vmatpush.bf16.msra.mxu3 %v3409_v32  ;;  %v4644_v32 = vld [vmem:[#allocation5 + $0x1cc] sm:$0xf0]  ;;  %v4594_v15 = vld [vmem:[#allocation5 + $0x44] sm:$0xf] }
  0xc7   :  { %1593 = vmatpush.bf16.msra.mxu2 %v3537_v33  ;;  %v1274_v33 = vadd.f32 %v4942_v16, %v272_v21  ;;  %v3977_v40 = vor.u32 %v4644_v32, %v3976_v29  ;;  %v3816_v16 = vld [vmem:[#allocation5 + $0x80] sm:$0xf]  ;;  %v3866_v21 = vld [vmem:[#allocation5 + $0xf0] sm:$0xf0] }
  0xc8   :  { %1569 = vmatpush.bf16.msrb.mxu1 %v3249_v52  ;;  %1607 = vmatpush.bf16.msra.mxu0 %v3649_v58  ;;  %v3817_v53 = vor.u32 %v4604_v44, %v3816_v16  ;;  %v4088_v44 = vld [vmem:[#allocation5 + $0x2a0] sm:$0xf] }
  0xc9   :  { %v1287_v43 = vadd.f32 %v4944_v25, %v1274_v33  ;;  %v3800_v25 = vld [vmem:[#allocation5 + $0x60] sm:$0xf] }
  0xca   :  { %1581 = vmatpush.bf16.msra.mxu3 %v3393_v48  ;;  %v3944_v48 = vld [vmem:[#allocation5 + $0x180] sm:$0xf]  ;;  %v3801_v59 = vor.u32 %v4600_v54, %v3800_v25  ;;  %v4668_v54 = vld [vmem:[#allocation5 + $0x28c] sm:$0xf0] }
  0xcb   :  { %1594 = vmatpush.bf16.msra.mxu2 %v3521_v49  ;;  %v1325_v47 = vpop.f32.mrf.mxu0  ;;  %v4636_v49 = vld [vmem:[#allocation5 + $0x18c] sm:$0xf0]  ;;  %v1300_v50 = vadd.f32 %v4946_v31, %v1287_v43  ;;  %v3978_v43 = vld [vmem:[#allocation5 + $0x1d0] sm:$0xf0]  ;;  %v4072_v25 = vld [vmem:[#allocation5 + $0x280] sm:$0xf] }
  0xcc   :  { %1570 = vmatpush.bf16.msrb.mxu1 %v3233_v8  ;;  %1608 = vmatpush.bf16.msra.mxu0 %v3633_v13  ;;  %v1353_v52 = vpop.f32.mrf.mxu2  ;;  %v3768_v8 = vld [vmem:[#allocation5 + $0x20] sm:$0xf] }
  0xcd   :  { %v1313_v58 = vadd.f32 %v4948_v37, %v1300_v50  ;;  %v3769_v13 = vor.u32 %v4592_v9, %v3768_v8  ;;  %v3962_v52 = vld [vmem:[#allocation5 + $0x1b0] sm:$0xf0]  ;;  %v4630_v9 = vld [vmem:[#allocation5 + $0x164] sm:$0xf] }
  0xce   :  { %1582 = vmatpush.bf16.msra.mxu3 %v3377_v4 }
  0xcf   :  { %1595 = vmatpush.bf16.msra.mxu2 %v3505_v5  ;;  %1571 = vmatmul.bf16.vlgmr.msrb.gmra.mxu1 %v4890_v51  ;;  %v3833_v51 = vor.u32 %v4608_v39, %v3832_v38  ;;  %v1326_v60 = vadd.f32 %v1325_v47, %v1313_v58  ;;  %v3785_v5 = vor.u32 %v4596_v62, %v3784_v61  ;;  %v4610_v38 = vld [vmem:[#allocation5 + $0xc4] sm:$0xf]  ;;  %v3850_v39 = vld [vmem:[#allocation5 + $0xd0] sm:$0xf0] }
  0xd0   :  { %1622 = vmatpush.bf16.msra.mxu1 %v3745_v17  ;;  %1609 = vmatpush.bf16.msra.mxu0 %v3617_v7  ;;  %v3897_v17 = vor.u32 %v4624_v12, %v3896_v11  ;;  %v4646_v7 = vld [vmem:[#allocation5 + $0x1e4] sm:$0xf]  ;;  %v3853_v16 = vor.u32 %v4610_v38, %v3850_v39  ;;  %v4073_v58 = vor.u32 %v4668_v54, %v4072_v25  ;;  %v4040_v12 = vld [vmem:[#allocation5 + $0x240] sm:$0xf] }
  0xd1   :  { %v4606_v47 = vld [vmem:[#allocation5 + $0xa4] sm:$0xf] }
  0xd2   :  { %1583 = vmatpush.bf16.msra.mxu3 %v3361_v22  ;;  %v3880_v22 = vld [vmem:[#allocation5 + $0x100] sm:$0xf]  ;;  %v4586_v38 = vld [vmem:[#allocation5 + $0x4] sm:$0xf] }
  0xd3   :  { %1596 = vmatpush.bf16.msra.mxu2 %v3489_v23  ;;  %1610 = vmatmul.bf16.vlgmr.msra.gmra.mxu0 %v4920_v35  ;;  %v4632_v35 = vld [vmem:[#allocation5 + $0x16c] sm:$0xf0]  ;;  %v1327_v3 = vpop.f32.mrf.mxu0 }
  0xd4   :  { %2427 = vmatpush.bf16.msrb.mxu1 %v3993_v28  ;;  %v3929_v63 = vor.u32 %v4632_v35, %v3928_v56  ;;  %v4966_v31 = vpop.f32.mrf.mxu3  ;;  %v4620_v23 = vld [vmem:[#allocation5 + $0x10c] sm:$0xf0]  ;;  %v3818_v56 = vld [vmem:[#allocation5 + $0x90] sm:$0xf0] }
  0xd5   :  { %1584 = vmatmul.bf16.vlgmr.msra.gmra.mxu3 %v4894_v57  ;;  %v1338_v57 = vpop.f32.mrf.mxu1  ;;  %v3881_v33 = vor.u32 %v4620_v23, %v3880_v22  ;;  %v1365_v14 = vadd.f32 %v4966_v31, %v273_v1 }
  0xd6   :  { %2414 = vmatpush.bf16.msrb.mxu3 %v3865_v24  ;;  %1597 = vmatmul.bf16.vlgmr.msra.gmra.mxu2 %v4918_v30  ;;  %v3945_v30 = vor.u32 %v4636_v49, %v3944_v48  ;;  %v1339_v37 = vadd.f32 %v1338_v57, %v1326_v60  ;;  %v4121_v24 = vor.u32 %v4680_v19, %v4120_v18  ;;  %v3834_v48 = vld [vmem:[#allocation5 + $0xb0] sm:$0xf0]  ;;  %v4638_v57 = vld [vmem:[#allocation5 + $0x1a4] sm:$0xf] }
  0xd7   :  { %v3981_v49 = vor.u32 %v4642_v42, %v3978_v43  ;;  %v3965_v35 = vor.u32 %v4638_v57, %v3962_v52  ;;  %v3946_v60 = vld [vmem:[#allocation5 + $0x190] sm:$0xf0]  ;;  %v4626_v19 = vld [vmem:[#allocation5 + $0x144] sm:$0xf]  ;;  %v4652_v42 = vld [vmem:[#allocation5 + $0x20c] sm:$0xf0] }
  0xd8   :  { %2428 = vmatpush.bf16.msrb.mxu1 %v3977_v40  ;;  %v1352_v55 = vadd.f32 %v4958_v34, %v1339_v37  ;;  %2440 = vmatpush.bf16.msrb.mxu2 %v4121_v24  ;;  %v4104_v34 = vld [vmem:[#allocation5 + $0x2c0] sm:$0xf]  ;;  %v3997_v40 = vor.u32 %v4646_v7, %v3994_v26  ;;  %v4656_v7 = vld [vmem:[#allocation5 + $0x22c] sm:$0xf0]  ;;  %v3872_v43 = vld [vmem:[#allocation5 + $0xe8] sm:$0xf] }
  0xd9   :  { %v4970_v6 = vpop.f32.mrf.mxu2  ;;  %v4024_v24 = vld [vmem:[#allocation5 + $0x220] sm:$0xf] }
  0xda   :  { %2415 = vmatpush.bf16.msrb.mxu3 %v3849_v36  ;;  %v1628_v29 = vmax.f32 %v1352_v55, 0.0  ;;  %v4676_v36 = vld [vmem:[#allocation5 + $0x2cc] sm:$0xf0]  ;;  %v3786_v55 = vld [vmem:[#allocation5 + $0x50] sm:$0xf0]  ;;  %v1378_v26 = vadd.f32 %v4970_v6, %v1365_v14 }
  0xdb   :  { %v4105_v41 = vor.u32 %v4676_v36, %v4104_v34  ;;  %v3789_v23 = vor.u32 %v4594_v15, %v3786_v55  ;;  %v3898_v34 = vld [vmem:[#allocation5 + $0x130] sm:$0xf0]  ;;  %v4000_v14 = vld [vmem:[#allocation5 + $0x1e8] sm:$0xf]  ;;  %v4649_v15 = vld [vmem:[#allocation5 + $0x1f4] sm:$0xf0] }
  0xdc   :  { %2429 = vmatpush.bf16.msrb.mxu1 %v3961_v46  ;;  %v1366_v20 = vpop.f32.mrf.mxu3  ;;  %v4672_v46 = vld [vmem:[#allocation5 + $0x2ac] sm:$0xf0] }
  0xdd   :  { %v1340_v4 = vpop.f32.mrf.mxu1  ;;  %2441 = vmatpush.bf16.msrb.mxu2 %v4105_v41  ;;  %v4089_v50 = vor.u32 %v4672_v46, %v4088_v44  ;;  %v3914_v20 = vld [vmem:[#allocation5 + $0x150] sm:$0xf0]  ;;  %v4008_v41 = vld [vmem:[#allocation5 + $0x200] sm:$0xf]  ;;  %v4678_v44 = vld [vmem:[#allocation5 + $0x2e4] sm:$0xf] }
  0xde   :  { %2416 = vmatpush.bf16.msrb.mxu3 %v3833_v51  ;;  %v4973_v51 = vpack.c.bf16 %v1628_v29, %v1628_v29  ;;  %v4598_v4 = vld [vmem:[#allocation5 + $0x64] sm:$0xf]  ;;  %v3917_v31 = vor.u32 %v4626_v19, %v3914_v20  ;;  %v4009_v6 = vor.u32 %v4652_v42, %v4008_v41  ;;  %v4122_v46 = vld [vmem:[#allocation5 + $0x2f0] sm:$0xf0]  ;;  %v4605_v19 = vld [vmem:[#allocation5 + $0x94] sm:$0xf0] }
  0xdf   :  { %3749 = vmatmul.msk.bf16.vlgmr.msra.gmra.mxu1 %vm1260_vm0, %v4908_v45  ;;  %v4614_v45 = vld [vmem:[#allocation5 + $0xe4] sm:$0xf]  ;;  %v4125_v57 = vor.u32 %v4678_v44, %v4122_v46  ;;  %v4200_v42 = vld [vmem:[#allocation5 + $0x380] sm:$0xf] }
  0xe0   :  { %2430 = vmatpush.bf16.msrb.mxu1 %v3945_v30  ;;  %v3869_v32 = vor.u32 %v4614_v45, %v3866_v21  ;;  %v4602_v30 = vld [vmem:[#allocation5 + $0x84] sm:$0xf] }
  0xe1   :  { %v1379_v28 = vpop.f32.mrf.mxu2  ;;  %2442 = vmatpush.bf16.msrb.mxu2 %v4089_v50  ;;  %v3821_v62 = vor.u32 %v4602_v30, %v3818_v56  ;;  %v3882_v50 = vld [vmem:[#allocation5 + $0x110] sm:$0xf0]  ;;  %v3856_v56 = vld [vmem:[#allocation5 + $0xc8] sm:$0xf]  ;;  %v4666_v20 = vld [vmem:[#allocation5 + $0x284] sm:$0xf] }
  0xe2   :  { %2417 = vmatpush.bf16.msrb.mxu3 %v3817_v53  ;;  %v3837_v53 = vor.u32 %v4606_v47, %v3834_v48  ;;  %v3770_v28 = vld [vmem:[#allocation5 + $0x30] sm:$0xf0]  ;;  %v4617_v48 = vld [vmem:[#allocation5 + $0xf4] sm:$0xf0] }
  0xe3   :  { %v3873_v30 = vor.u32 %v4617_v48, %v3872_v43  ;;  %v4700_v43 = vld [vmem:[#allocation5 + $0x38c] sm:$0xf0]  ;;  %v3792_v48 = vld [vmem:[#allocation5 + $0x48] sm:$0xf] }
  0xe4   :  { %2431 = vmatpush.bf16.msrb.mxu1 %v3929_v63  ;;  %v4056_v63 = vld [vmem:[#allocation5 + $0x260] sm:$0xf]  ;;  %v4201_v44 = vor.u32 %v4700_v43, %v4200_v42  ;;  %v4710_v42 = vld [vmem:[#allocation5 + $0x3e4] sm:$0xf]  ;;  %v4250_v43 = vld [vmem:[#allocation5 + $0x3f0] sm:$0xf0] }
  0xe5   :  { %2443 = vmatpush.bf16.msrb.mxu2 %v4073_v58  ;;  %v4057_v8 = vor.u32 %v4664_v0, %v4056_v63  ;;  %v4674_v58 = vld [vmem:[#allocation5 + $0x2c4] sm:$0xf]  ;;  %v4712_v63 = vld [vmem:[#allocation5 + $0x3ec] sm:$0xf0] }
  0xe6   :  { %2418 = vmatpush.bf16.msrb.mxu3 %v3801_v59  ;;  %v4634_v59 = vld [vmem:[#allocation5 + $0x184] sm:$0xf] }
  0xe7   :  { %v3949_v37 = vor.u32 %v4634_v59, %v3946_v60  ;;  %v4106_v59 = vld [vmem:[#allocation5 + $0x2d0] sm:$0xf0]  ;;  %v4613_v60 = vld [vmem:[#allocation5 + $0xd4] sm:$0xf0] }
  0xe8   :  { %2432 = vmatpush.bf16.msrb.mxu1 %v3913_v10  ;;  %v3930_v10 = vld [vmem:[#allocation5 + $0x170] sm:$0xf0] }
  0xe9   :  { %2444 = vmatpush.bf16.msrb.mxu2 %v4057_v8  ;;  %v3933_v45 = vor.u32 %v4630_v9, %v3930_v10  ;;  %v4609_v9 = vld [vmem:[#allocation5 + $0xb4] sm:$0xf0] }
  0xea   :  { %2419 = vmatpush.bf16.msrb.mxu3 %v3785_v5  ;;  %v3802_v5 = vld [vmem:[#allocation5 + $0x70] sm:$0xf0] }
  0xeb   :  { %v1390_v61 = vpop.f32.mrf.mxu0  ;;  %v3805_v11 = vor.u32 %v4598_v4, %v3802_v5  ;;  %v3840_v4 = vld [vmem:[#allocation5 + $0xa8] sm:$0xf]  ;;  %v4670_v5 = vld [vmem:[#allocation5 + $0x2a4] sm:$0xf] }
  0xec   :  { %2433 = vmatpush.bf16.msrb.mxu1 %v3897_v17  ;;  %v1391_v36 = vadd.f32 %v1390_v61, %v1378_v26  ;;  %v4109_v61 = vor.u32 %v4674_v58, %v4106_v59  ;;  %v3984_v26 = vld [vmem:[#allocation5 + $0x1c8] sm:$0xf] }
  0xed   :  { %v3776_v59 = vld [vmem:[#allocation5 + $0x28] sm:$0xf] }
  0xee   :  { %2420 = vmatpush.bf16.msrb.mxu3 %v3769_v13  ;;  %v1403_v3 = vpop.f32.mrf.mxu1  ;;  %v4660_v13 = vld [vmem:[#allocation5 + $0x24c] sm:$0xf0] }
  0xef   :  { %v4041_v17 = vor.u32 %v4660_v13, %v4040_v12  ;;  %v1404_v52 = vadd.f32 %v1403_v3, %v1391_v36  ;;  %v3857_v3 = vor.u32 %v4613_v60, %v3856_v56  ;;  %v4708_v12 = vld [vmem:[#allocation5 + $0x3cc] sm:$0xf0]  ;;  %v4637_v56 = vld [vmem:[#allocation5 + $0x194] sm:$0xf0]  ;;  %v4654_v60 = vld [vmem:[#allocation5 + $0x224] sm:$0xf] }
  0xf0   :  { %2434 = vmatpush.bf16.msrb.mxu1 %v3881_v33  ;;  %v4622_v33 = vld [vmem:[#allocation5 + $0x124] sm:$0xf] }
  0xf1   :  { %2445 = vmatpush.bf16.msrb.mxu2 %v4041_v17 }
  0xf2   :  { %2421 = vmatpush.bf16.msrb.mxu3 %v3753_v27  ;;  %v4590_v27 = vld [vmem:[#allocation5 + $0x24] sm:$0xf] }
  0xf3   :  { %v1392_v21 = vpop.f32.mrf.mxu0  ;;  %v3773_v39 = vor.u32 %v4590_v27, %v3770_v28  ;;  %v4645_v27 = vld [vmem:[#allocation5 + $0x1d4] sm:$0xf0] }
  0xf4   :  { %2479 = vmatpush.bf16.msra.mxu1 %v3997_v40  ;;  %v1416_v18 = vpop.f32.mrf.mxu3  ;;  %v3754_v40 = vld [vmem:[#allocation5 + $0x10] sm:$0xf0]  ;;  %v4001_v21 = vor.u32 %v4649_v15, %v4000_v14  ;;  %v4589_v14 = vld [vmem:[#allocation5 + $0x14] sm:$0xf0]  ;;  %v4650_v15 = vld [vmem:[#allocation5 + $0x204] sm:$0xf] }
  0xf5   :  { %2422 = vmatmul.bf16.vlgmr.msrb.gmra.mxu3 %v4973_v51  ;;  %v1417_v54 = vadd.f32 %v1416_v18, %v1404_v52  ;;  %v3841_v18 = vor.u32 %v4609_v9, %v3840_v4  ;;  %v4597_v52 = vld [vmem:[#allocation5 + $0x54] sm:$0xf0]  ;;  %v4168_v4 = vld [vmem:[#allocation5 + $0x340] sm:$0xf] }
  0xf6   :  { %2466 = vmatpush.bf16.msra.mxu3 %v3869_v32  ;;  %v1405_v29 = vpop.f32.mrf.mxu1  ;;  %v4025_v32 = vor.u32 %v4656_v7, %v4024_v24  ;;  %v4704_v24 = vld [vmem:[#allocation5 + $0x3ac] sm:$0xf0]  ;;  %v3793_v58 = vor.u32 %v4597_v52, %v3792_v48  ;;  %v3842_v52 = vld [vmem:[#allocation5 + $0xb8] sm:$0xf0] }
  0xf8   :  { %2480 = vmatpush.bf16.msra.mxu1 %v3981_v49  ;;  %2446 = vmatpush.bf16.msrb.mxu2 %v4025_v32  ;;  %v4618_v49 = vld [vmem:[#allocation5 + $0x104] sm:$0xf]  ;;  %v3808_v32 = vld [vmem:[#allocation5 + $0x68] sm:$0xf] }
  0xf9   :  { %v1429_v22 = vpop.f32.mrf.mxu2 }
  0xfa   :  { %2467 = vmatpush.bf16.msra.mxu3 %v3853_v16  ;;  %v3901_v16 = vor.u32 %v4622_v33, %v3898_v34  ;;  %v1430_v1 = vadd.f32 %v1429_v22, %v1417_v54  ;;  %v4074_v22 = vld [vmem:[#allocation5 + $0x290] sm:$0xf0]  ;;  %v4662_v33 = vld [vmem:[#allocation5 + $0x264] sm:$0xf]  ;;  %v4696_v54 = vld [vmem:[#allocation5 + $0x36c] sm:$0xf0] }
  0xfb   :  { %v4077_v28 = vor.u32 %v4666_v20, %v4074_v22  ;;  %v4058_v34 = vld [vmem:[#allocation5 + $0x270] sm:$0xf0]  ;;  %v4688_v20 = vld [vmem:[#allocation5 + $0x32c] sm:$0xf0]  ;;  %v4615_v22 = vld [vmem:[#allocation5 + $0xec] sm:$0xf] }
  0xfc   :  { %2481 = vmatpush.bf16.msra.mxu1 %v3965_v35  ;;  %v1418_v47 = vpop.f32.mrf.mxu3  ;;  %2447 = vmatpush.bf16.msrb.mxu2 %v4009_v6  ;;  %v3885_v35 = vor.u32 %v4618_v49, %v3882_v50  ;;  %v4061_v41 = vor.u32 %v4662_v33, %v4058_v34  ;;  %v4641_v6 = vld [vmem:[#allocation5 + $0x1b4] sm:$0xf0]  ;;  %v4658_v49 = vld [vmem:[#allocation5 + $0x244] sm:$0xf]  ;;  %v4042_v50 = vld [vmem:[#allocation5 + $0x250] sm:$0xf0] }
  0xfe   :  { %2468 = vmatpush.bf16.msra.mxu3 %v3837_v53  ;;  %v3757_v53 = vor.u32 %v4586_v38, %v3754_v40  ;;  %v4601_v40 = vld [vmem:[#allocation5 + $0x74] sm:$0xf0] }
  0xff   :  { %v3809_v47 = vor.u32 %v4601_v40, %v3808_v32  ;;  %v4611_v32 = vld [vmem:[#allocation5 + $0xcc] sm:$0xf]  ;;  %v3858_v40 = vld [vmem:[#allocation5 + $0xd8] sm:$0xf0] }
 0x100   :  { %2482 = vmatpush.bf16.msra.mxu1 %v3949_v37  ;;  %2492 = vmatpush.bf16.msra.mxu2 %v4125_v57  ;;  %v4090_v37 = vld [vmem:[#allocation5 + $0x2b0] sm:$0xf0]  ;;  %v3861_v48 = vor.u32 %v4611_v32, %v3858_v40  ;;  %v3778_v40 = vld [vmem:[#allocation5 + $0x38] sm:$0xf0] }
 0x101   :  { %v1431_v25 = vpop.f32.mrf.mxu2  ;;  %v4093_v10 = vor.u32 %v4670_v5, %v4090_v37  ;;  %v4692_v5 = vld [vmem:[#allocation5 + $0x34c] sm:$0xf0]  ;;  %v3936_v37 = vld [vmem:[#allocation5 + $0x168] sm:$0xf] }
 0x102   :  { %2469 = vmatpush.bf16.msra.mxu3 %v3821_v62  ;;  %v4248_v62 = vld [vmem:[#allocation5 + $0x3e0] sm:$0xf]  ;;  %v4169_v9 = vor.u32 %v4692_v5, %v4168_v4  ;;  %v4643_v5 = vld [vmem:[#allocation5 + $0x1cc] sm:$0xf] }
 0x103   :  { %v4249_v0 = vor.u32 %v4712_v63, %v4248_v62  ;;  %v4184_v25 = vld [vmem:[#allocation5 + $0x360] sm:$0xf] }
 0x104   :  { %2483 = vmatpush.bf16.msra.mxu1 %v3933_v45  ;;  %2493 = vmatpush.bf16.msra.mxu2 %v4109_v61  ;;  %v1442_v8 = vpop.f32.mrf.mxu3  ;;  %v3824_v45 = vld [vmem:[#allocation5 + $0x88] sm:$0xf]  ;;  %v4026_v61 = vld [vmem:[#allocation5 + $0x230] sm:$0xf0] }
 0x105   :  { %2453 = vmatpush.bf16.msrb.mxu0 %v4249_v0  ;;  %v1443_v13 = vadd.f32 %v1442_v8, %v1430_v1  ;;  %v3825_v29 = vor.u32 %v4605_v19, %v3824_v45  ;;  %v4593_v1 = vld [vmem:[#allocation5 + $0x34] sm:$0xf0]  ;;  %v4152_v19 = vld [vmem:[#allocation5 + $0x320] sm:$0xf] }
 0x106   :  { %2470 = vmatpush.bf16.msra.mxu3 %v3805_v11  ;;  %v4232_v11 = vld [vmem:[#allocation5 + $0x3c0] sm:$0xf]  ;;  %v4633_v8 = vld [vmem:[#allocation5 + $0x174] sm:$0xf0] }
 0x107   :  { %v4233_v55 = vor.u32 %v4708_v12, %v4232_v11  ;;  %v1629_v17 = vmax.f32 %v1443_v13, 0.0  ;;  %v3760_v11 = vld [vmem:[#allocation5 + $0x8] sm:$0xf]  ;;  %v3777_v13 = vor.u32 %v4593_v1, %v3776_v59  ;;  %v3937_v45 = vor.u32 %v4633_v8, %v3936_v37  ;;  %v4702_v1 = vld [vmem:[#allocation5 + $0x3a4] sm:$0xf] }
 0x108   :  { %2484 = vmatpush.bf16.msra.mxu1 %v3917_v31  ;;  %2494 = vmatpush.bf16.msra.mxu2 %v4093_v10 }
 0x109   :  { %2454 = vmatpush.bf16.msrb.mxu0 %v4233_v55  ;;  %v4980_v7 = vpack.c.bf16 %v1629_v17, %v1629_v17  ;;  %v4010_v55 = vld [vmem:[#allocation5 + $0x210] sm:$0xf0]  ;;  %v3920_v17 = vld [vmem:[#allocation5 + $0x148] sm:$0xf] }
 0x10a   :  { %2471 = vmatpush.bf16.msra.mxu3 %v3789_v23  ;;  %v4216_v23 = vld [vmem:[#allocation5 + $0x3a0] sm:$0xf] }
 0x10b   :  { %v4217_v31 = vor.u32 %v4704_v24, %v4216_v23  ;;  %2435 = vmatmul.bf16.vlgmr.msrb.gmra.mxu1 %v4980_v7  ;;  %v4983_v38 = vpop.f32.mrf.mxu0  ;;  %v3874_v23 = vld [vmem:[#allocation5 + $0xf8] sm:$0xf0]  ;;  %v4153_v24 = vor.u32 %v4688_v20, %v4152_v19  ;;  %v4595_v19 = vld [vmem:[#allocation5 + $0x4c] sm:$0xf] }
 0x10c   :  { %2485 = vmatpush.bf16.msra.mxu1 %v3901_v16  ;;  %v1444_v36 = vpop.f32.mrf.mxu3  ;;  %2495 = vmatpush.bf16.msra.mxu2 %v4077_v28  ;;  %v3968_v16 = vld [vmem:[#allocation5 + $0x1a8] sm:$0xf]  ;;  %v4625_v28 = vld [vmem:[#allocation5 + $0x134] sm:$0xf0] }
 0x10d   :  { %2455 = vmatpush.bf16.msrb.mxu0 %v4217_v31  ;;  %v3969_v57 = vor.u32 %v4641_v6, %v3968_v16  ;;  %v4136_v36 = vld [vmem:[#allocation5 + $0x300] sm:$0xf]  ;;  %v274_v16 = vperm.slane %v4953_v2, 2 }
 0x10e   :  { %2472 = vmatpush.bf16.msra.mxu3 %v3773_v39  ;;  %v3985_v39 = vor.u32 %v4645_v27, %v3984_v26  ;;  %v4985_v46 = vpop.f32.mrf.mxu1  ;;  %v3761_v26 = vor.u32 %v4589_v14, %v3760_v11  ;;  %v3904_v27 = vld [vmem:[#allocation5 + $0x128] sm:$0xf]  ;;  %v4599_v11 = vld [vmem:[#allocation5 + $0x6c] sm:$0xf]  ;;  %v4698_v14 = vld [vmem:[#allocation5 + $0x384] sm:$0xf] }
 0x110   :  { %2486 = vmatpush.bf16.msra.mxu1 %v3885_v35  ;;  %2496 = vmatpush.bf16.msra.mxu2 %v4061_v41  ;;  %v4185_v35 = vor.u32 %v4696_v54, %v4184_v25  ;;  %v4234_v25 = vld [vmem:[#allocation5 + $0x3d0] sm:$0xf0]  ;;  %v1456_v54 = vadd.f32 %v4985_v46, %v274_v16  ;;  %v3986_v46 = vld [vmem:[#allocation5 + $0x1d8] sm:$0xf0]  ;;  %v4631_v16 = vld [vmem:[#allocation5 + $0x16c] sm:$0xf] }
 0x111   :  { %2456 = vmatpush.bf16.msrb.mxu0 %v4201_v44  ;;  %v4253_v44 = vor.u32 %v4710_v42, %v4250_v43  ;;  %v4170_v42 = vld [vmem:[#allocation5 + $0x350] sm:$0xf0] }
 0x112   :  { %2473 = vmatpush.bf16.msra.mxu3 %v3757_v53  ;;  %v4045_v53 = vor.u32 %v4658_v49, %v4042_v50  ;;  %v3888_v49 = vld [vmem:[#allocation5 + $0x108] sm:$0xf]  ;;  %v4621_v50 = vld [vmem:[#allocation5 + $0x114] sm:$0xf0] }
 0x113   :  { %v1483_v63 = vpop.f32.mrf.mxu0 }
 0x114   :  { %2531 = vmatpush.bf16.msrb.mxu1 %v4001_v21  ;;  %2497 = vmatpush.bf16.msra.mxu2 %v4045_v53  ;;  %v4629_v21 = vld [vmem:[#allocation5 + $0x154] sm:$0xf0]  ;;  %v4706_v53 = vld [vmem:[#allocation5 + $0x3c4] sm:$0xf] }
 0x115   :  { %2474 = vmatmul.bf16.vlgmr.msra.gmra.mxu3 %v4973_v51  ;;  %2457 = vmatpush.bf16.msrb.mxu0 %v4185_v35  ;;  %v3921_v31 = vor.u32 %v4629_v21, %v3920_v17  ;;  %v4237_v35 = vor.u32 %v4706_v53, %v4234_v25  ;;  %v3970_v17 = vld [vmem:[#allocation5 + $0x1b8] sm:$0xf0]  ;;  %v4686_v25 = vld [vmem:[#allocation5 + $0x324] sm:$0xf] }
 0x116   :  { %2518 = vmatpush.bf16.msrb.mxu3 %v3873_v30  ;;  %v3952_v30 = vld [vmem:[#allocation5 + $0x188] sm:$0xf]  ;;  %v1457_v12 = vpop.f32.mrf.mxu1  ;;  %v3794_v21 = vld [vmem:[#allocation5 + $0x58] sm:$0xf0] }
 0x117   :  { %v3953_v0 = vor.u32 %v4637_v56, %v3952_v30  ;;  %v4647_v30 = vld [vmem:[#allocation5 + $0x1ec] sm:$0xf]  ;;  %v4002_v56 = vld [vmem:[#allocation5 + $0x1f8] sm:$0xf0]  ;;  %v3989_v12 = vor.u32 %v4643_v5, %v3986_v46  ;;  %v4138_v5 = vld [vmem:[#allocation5 + $0x310] sm:$0xf0] }
 0x118   :  { %2532 = vmatpush.bf16.msrb.mxu1 %v3985_v39  ;;  %v4987_v62 = vpop.f32.mrf.mxu3  ;;  %v4684_v39 = vld [vmem:[#allocation5 + $0x30c] sm:$0xf0]  ;;  %v4005_v63 = vor.u32 %v4647_v30, %v4002_v56  ;;  %v3762_v53 = vld [vmem:[#allocation5 + $0x18] sm:$0xf0]  ;;  %v4627_v56 = vld [vmem:[#allocation5 + $0x14c] sm:$0xf] }
 0x119   :  { %v4989_v10 = vpop.f32.mrf.mxu2  ;;  %2458 = vmatpush.bf16.msrb.mxu0 %v4169_v9  ;;  %v4137_v41 = vor.u32 %v4684_v39, %v4136_v36  ;;  %v1469_v4 = vadd.f32 %v4987_v62, %v1456_v54  ;;  %v4154_v54 = vld [vmem:[#allocation5 + $0x330] sm:$0xf0]  ;;  %v4623_v46 = vld [vmem:[#allocation5 + $0x12c] sm:$0xf] }
 0x11a   :  { %2519 = vmatpush.bf16.msrb.mxu3 %v3857_v3  ;;  %v4029_v3 = vor.u32 %v4654_v60, %v4026_v61  ;;  %v4603_v60 = vld [vmem:[#allocation5 + $0x8c] sm:$0xf] }
 0x11b   :  { %2487 = vmatmul.bf16.vlgmr.msra.gmra.mxu1 %v4980_v7  ;;  %v4992_v34 = vpop.f32.mrf.mxu0 }
 0x11c   :  { %2533 = vmatpush.bf16.msrb.mxu1 %v3969_v57  ;;  %2498 = vmatpush.bf16.msra.mxu2 %v4029_v3  ;;  %v4607_v57 = vld [vmem:[#allocation5 + $0xac] sm:$0xf]  ;;  %v4218_v3 = vld [vmem:[#allocation5 + $0x3b0] sm:$0xf0] }
 0x11d   :  { %2459 = vmatpush.bf16.msrb.mxu0 %v4153_v24  ;;  %v3845_v59 = vor.u32 %v4607_v57, %v3842_v52  ;;  %v4221_v37 = vor.u32 %v4702_v1, %v4218_v3  ;;  %v4587_v57 = vld [vmem:[#allocation5 + $0xc] sm:$0xf] }
 0x11e   :  { %2520 = vmatpush.bf16.msrb.mxu3 %v3841_v18  ;;  %v4013_v18 = vor.u32 %v4650_v15, %v4010_v55  ;;  %v4202_v15 = vld [vmem:[#allocation5 + $0x390] sm:$0xf0]  ;;  %v1482_v55 = vadd.f32 %v4983_v38, %v1469_v4  ;;  %v4682_v4 = vld [vmem:[#allocation5 + $0x304] sm:$0xf] }
 0x11f   :  { %v4205_v62 = vor.u32 %v4698_v14, %v4202_v15  ;;  %v4619_v15 = vld [vmem:[#allocation5 + $0x10c] sm:$0xf] }
 0x120   :  { %2534 = vmatpush.bf16.msrb.mxu1 %v3953_v0  ;;  %v1470_v33 = vpop.f32.mrf.mxu3  ;;  %2499 = vmatpush.bf16.msra.mxu2 %v4013_v18  ;;  %v3826_v0 = vld [vmem:[#allocation5 + $0x98] sm:$0xf0]  ;;  %v1495_v24 = vadd.f32 %v4989_v10, %v1482_v55 }
 0x121   :  { %v1496_v6 = vpop.f32.mrf.mxu2  ;;  %2460 = vmatpush.bf16.msrb.mxu0 %v4137_v41  ;;  %v3829_v9 = vor.u32 %v4603_v60, %v3826_v0  ;;  %v4591_v33 = vld [vmem:[#allocation5 + $0x2c] sm:$0xf]  ;;  %v4690_v41 = vld [vmem:[#allocation5 + $0x344] sm:$0xf]  ;;  %v3938_v10 = vld [vmem:[#allocation5 + $0x178] sm:$0xf0] }
 0x122   :  { %2521 = vmatpush.bf16.msrb.mxu3 %v3825_v29  ;;  %v3877_v29 = vor.u32 %v4615_v22, %v3874_v23  ;;  %v4694_v22 = vld [vmem:[#allocation5 + $0x364] sm:$0xf]  ;;  %v4186_v23 = vld [vmem:[#allocation5 + $0x370] sm:$0xf0]  ;;  %v3941_v52 = vor.u32 %v4631_v16, %v3938_v10  ;;  %v4677_v0 = vld [vmem:[#allocation5 + $0x2d4] sm:$0xf0] }
 0x123   :  { %v1535_v61 = vpop.f32.mrf.mxu0  ;;  %v4189_v38 = vor.u32 %v4694_v22, %v4186_v23  ;;  %v3890_v55 = vld [vmem:[#allocation5 + $0x118] sm:$0xf0]  ;;  %v4665_v22 = vld [vmem:[#allocation5 + $0x274] sm:$0xf0]  ;;  %v4679_v10 = vld [vmem:[#allocation5 + $0x2ec] sm:$0xf] }
 0x124   :  { %2535 = vmatpush.bf16.msrb.mxu1 %v3937_v45  ;;  %v4639_v45 = vld [vmem:[#allocation5 + $0x1ac] sm:$0xf] }
 0x125   :  { %2505 = vmatpush.bf16.msra.mxu0 %v4253_v44  ;;  %v3973_v20 = vor.u32 %v4639_v45, %v3970_v17  ;;  %v4173_v44 = vor.u32 %v4690_v41, %v4170_v42  ;;  %v4080_v17 = vld [vmem:[#allocation5 + $0x288] sm:$0xf] }
 0x126   :  { %2522 = vmatpush.bf16.msrb.mxu3 %v3809_v47  ;;  %v3905_v47 = vor.u32 %v4625_v28, %v3904_v27  ;;  %v3954_v27 = vld [vmem:[#allocation5 + $0x198] sm:$0xf0] }
 0x128   :  { %2536 = vmatpush.bf16.msrb.mxu1 %v3921_v31 }
 0x129   :  { %2506 = vmatpush.bf16.msra.mxu0 %v4237_v35  ;;  %v3922_v35 = vld [vmem:[#allocation5 + $0x158] sm:$0xf0] }
 0x12a   :  { %2523 = vmatpush.bf16.msrb.mxu3 %v3793_v58  ;;  %v3889_v58 = vor.u32 %v4621_v50, %v3888_v49  ;;  %v4128_v49 = vld [vmem:[#allocation5 + $0x2e8] sm:$0xf]  ;;  %v4681_v50 = vld [vmem:[#allocation5 + $0x2f4] sm:$0xf0]  ;;  %v3925_v1 = vor.u32 %v4627_v56, %v3922_v35 }
 0x12b   :  { %v4129_v60 = vor.u32 %v4681_v50, %v4128_v49  ;;  %v4675_v50 = vld [vmem:[#allocation5 + $0x2cc] sm:$0xf] }
 0x12c   :  { %2537 = vmatpush.bf16.msrb.mxu1 %v3905_v47  ;;  %v1507_v8 = vpop.f32.mrf.mxu1 }
 0x12d   :  { %2507 = vmatpush.bf16.msra.mxu0 %v4221_v37  ;;  %v1508_v31 = vadd.f32 %v1507_v8, %v1495_v24  ;;  %v3906_v37 = vld [vmem:[#allocation5 + $0x138] sm:$0xf0] }
 0x12e   :  { %2524 = vmatpush.bf16.msrb.mxu3 %v3777_v13  ;;  %v3810_v13 = vld [vmem:[#allocation5 + $0x78] sm:$0xf0]  ;;  %v3909_v14 = vor.u32 %v4623_v46, %v3906_v37  ;;  %v4224_v37 = vld [vmem:[#allocation5 + $0x3a8] sm:$0xf] }
 0x12f   :  { %v3813_v18 = vor.u32 %v4599_v11, %v3810_v13  ;;  %v4673_v13 = vld [vmem:[#allocation5 + $0x2b4] sm:$0xf0]  ;;  %v4082_v46 = vld [vmem:[#allocation5 + $0x298] sm:$0xf0] }
 0x130   :  { %2538 = vmatpush.bf16.msrb.mxu1 %v3889_v58  ;;  %v5001_v28 = vpop.f32.mrf.mxu0 }
 0x131   :  { %2508 = vmatpush.bf16.msra.mxu0 %v4205_v62  ;;  %v4669_v62 = vld [vmem:[#allocation5 + $0x294] sm:$0xf0] }
 0x132   :  { %2525 = vmatpush.bf16.msrb.mxu3 %v3761_v26  ;;  %v4635_v26 = vld [vmem:[#allocation5 + $0x18c] sm:$0xf] }
 0x133   :  { %2539 = vmatmul.bf16.vlgmr.msrb.gmra.mxu1 %v4980_v7  ;;  %v3957_v39 = vor.u32 %v4635_v26, %v3954_v27  ;;  %v4048_v27 = vld [vmem:[#allocation5 + $0x248] sm:$0xf] }
 0x134   :  { %2583 = vmatpush.bf16.msra.mxu1 %v4005_v63  ;;  %v1509_v32 = vpop.f32.mrf.mxu1  ;;  %v4112_v63 = vld [vmem:[#allocation5 + $0x2c8] sm:$0xf] }
 0x135   :  { %2526 = vmatmul.bf16.vlgmr.msrb.gmra.mxu3 %v4973_v51  ;;  %2509 = vmatpush.bf16.msra.mxu0 %v4189_v38  ;;  %v4113_v11 = vor.u32 %v4677_v0, %v4112_v63  ;;  %v4657_v32 = vld [vmem:[#allocation5 + $0x234] sm:$0xf0]  ;;  %v4240_v63 = vld [vmem:[#allocation5 + $0x3c8] sm:$0xf] }
 0x136   :  { %2570 = vmatpush.bf16.msra.mxu3 %v3877_v29  ;;  %v3797_v29 = vor.u32 %v4595_v19, %v3794_v21  ;;  %v3893_v19 = vor.u32 %v4619_v15, %v3890_v55  ;;  %v4064_v21 = vld [vmem:[#allocation5 + $0x268] sm:$0xf]  ;;  %v4709_v0 = vld [vmem:[#allocation5 + $0x3d4] sm:$0xf0] }
 0x137   :  { %v4065_v26 = vor.u32 %v4665_v22, %v4064_v21  ;;  %v4701_v15 = vld [vmem:[#allocation5 + $0x394] sm:$0xf0]  ;;  %v4655_v22 = vld [vmem:[#allocation5 + $0x22c] sm:$0xf] }
 0x138   :  { %2584 = vmatpush.bf16.msra.mxu1 %v3989_v12  ;;  %v1520_v36 = vpop.f32.mrf.mxu3  ;;  %v1561_v58 = vpop.f32.mrf.mxu0  ;;  %v4096_v12 = vld [vmem:[#allocation5 + $0x2a8] sm:$0xf] }
 0x139   :  { %v1521_v43 = vadd.f32 %v1520_v36, %v1508_v31  ;;  %v1546_v6 = vpop.f32.mrf.mxu2  ;;  %2510 = vmatpush.bf16.msra.mxu0 %v4173_v44  ;;  %v4097_v45 = vor.u32 %v4673_v13, %v4096_v12  ;;  %v4663_v12 = vld [vmem:[#allocation5 + $0x26c] sm:$0xf]  ;;  %v4066_v13 = vld [vmem:[#allocation5 + $0x278] sm:$0xf0] }
 0x13a   :  { %2571 = vmatpush.bf16.msra.mxu3 %v3861_v48  ;;  %v3781_v48 = vor.u32 %v4591_v33, %v3778_v40  ;;  %v4069_v55 = vor.u32 %v4663_v12, %v4066_v13 }
 0x13b   :  { %v1534_v47 = vadd.f32 %v4992_v34, %v1521_v43  ;;  %v3765_v34 = vor.u32 %v4587_v57, %v3762_v53  ;;  %v4016_v43 = vld [vmem:[#allocation5 + $0x208] sm:$0xf]  ;;  %v4114_v57 = vld [vmem:[#allocation5 + $0x2d8] sm:$0xf0] }
 0x13c   :  { %2585 = vmatpush.bf16.msra.mxu1 %v3973_v20  ;;  %v4081_v20 = vor.u32 %v4669_v62, %v4080_v17  ;;  %v4117_v35 = vor.u32 %v4675_v50, %v4114_v57  ;;  %v4659_v17 = vld [vmem:[#allocation5 + $0x24c] sm:$0xf]  ;;  %v4050_v62 = vld [vmem:[#allocation5 + $0x258] sm:$0xf0]  ;;  %v5022_v57 = vld [vmem:[%s5147_s4] sm:$0xf] }
 0x13d   :  { %v1630_v30 = vmax.f32 %v1534_v47, 0.0  ;;  %v4210_v50 = vld [vmem:[#allocation5 + $0x398] sm:$0xf0] }
 0x13e   :  { %2572 = vmatpush.bf16.msra.mxu3 %v3845_v59  ;;  %v4157_v59 = vor.u32 %v4686_v25, %v4154_v54  ;;  %v4256_v25 = vld [vmem:[#allocation5 + $0x3e8] sm:$0xf]  ;;  %v4713_v54 = vld [vmem:[#allocation5 + $0x3f4] sm:$0xf0] }
 0x13f   :  { %v5004_v61 = vpack.c.bf16 %v1630_v30, %v1630_v30  ;;  %v4257_v58 = vor.u32 %v4713_v54, %v4256_v25  ;;  %v4194_v25 = vld [vmem:[#allocation5 + $0x378] sm:$0xf0] }
 0x140   :  { %2586 = vmatpush.bf16.msra.mxu1 %v3957_v39  ;;  %v1522_v3 = vpop.f32.mrf.mxu3  ;;  %2511 = vmatpush.bf16.msra.mxu0 %v4157_v59  ;;  %v4671_v59 = vld [vmem:[#allocation5 + $0x2ac] sm:$0xf] }
 0x141   :  { %2448 = vmatmul.bf16.vlgmr.msrb.gmra.mxu2 %v5004_v61  ;;  %v1548_v8 = vpop.f32.mrf.mxu2 }
 0x142   :  { %2573 = vmatpush.bf16.msra.mxu3 %v3829_v9  ;;  %v4141_v9 = vor.u32 %v4682_v4, %v4138_v5  ;;  %2544 = vmatpush.bf16.msrb.mxu2 %v4129_v60  ;;  %v4098_v60 = vld [vmem:[#allocation5 + $0x2b8] sm:$0xf0]  ;;  %v4241_v4 = vor.u32 %v4709_v0, %v4240_v63  ;;  %v4667_v5 = vld [vmem:[#allocation5 + $0x28c] sm:$0xf]  ;;  %v4705_v8 = vld [vmem:[#allocation5 + $0x3b4] sm:$0xf0] }
 0x143   :  { %v4687_v0 = vld [vmem:[#allocation5 + $0x32c] sm:$0xf] }
 0x144   :  { %2587 = vmatpush.bf16.msra.mxu1 %v3941_v52  ;;  %2512 = vmatpush.bf16.msra.mxu0 %v4141_v9  ;;  %v4085_v9 = vor.u32 %v4667_v5, %v4082_v46  ;;  %v4146_v5 = vld [vmem:[#allocation5 + $0x318] sm:$0xf0] }
 0x146   :  { %2574 = vmatpush.bf16.msra.mxu3 %v3813_v18  ;;  %2545 = vmatpush.bf16.msrb.mxu2 %v4113_v11  ;;  %v275_v18 = vperm.slane %v4953_v2, 3  ;;  %v4225_v11 = vor.u32 %v4705_v8, %v4224_v37 }
 0x148   :  { %2588 = vmatpush.bf16.msra.mxu1 %v3925_v1  ;;  %v1547_v23 = vadd.f32 %v1546_v6, %v275_v18  ;;  %v4130_v6 = vld [vmem:[#allocation5 + $0x2f8] sm:$0xf0]  ;;  %v4101_v1 = vor.u32 %v4671_v59, %v4098_v60  ;;  %v4192_v18 = vld [vmem:[#allocation5 + $0x368] sm:$0xf] }
 0x14a   :  { %2575 = vmatpush.bf16.msra.mxu3 %v3797_v29  ;;  %2546 = vmatpush.bf16.msrb.mxu2 %v4097_v45  ;;  %v1560_v38 = vadd.f32 %v5001_v28, %v1547_v23  ;;  %v4032_v29 = vld [vmem:[#allocation5 + $0x228] sm:$0xf]  ;;  %v4034_v23 = vld [vmem:[#allocation5 + $0x238] sm:$0xf0] }
 0x14b   :  { %v4033_v42 = vor.u32 %v4657_v32, %v4032_v29  ;;  %v4160_v29 = vld [vmem:[#allocation5 + $0x328] sm:$0xf]  ;;  %v4689_v32 = vld [vmem:[#allocation5 + $0x334] sm:$0xf0] }
 0x14c   :  { %2589 = vmatpush.bf16.msra.mxu1 %v3909_v14  ;;  %v1572_v24 = vpop.f32.mrf.mxu1  ;;  %v4208_v14 = vld [vmem:[#allocation5 + $0x388] sm:$0xf] }
 0x14d   :  { %v1573_v33 = vadd.f32 %v1572_v24, %v1560_v38  ;;  %v4209_v45 = vor.u32 %v4701_v15, %v4208_v14  ;;  %v4176_v24 = vld [vmem:[#allocation5 + $0x348] sm:$0xf]  ;;  %v4721_v14 = vld [vmem:[%s5148_s5 + $0x38] sm:$0xff] }
 0x14e   :  { %2576 = vmatpush.bf16.msra.mxu3 %v3781_v48  ;;  %2547 = vmatpush.bf16.msrb.mxu2 %v4081_v20  ;;  %v4133_v48 = vor.u32 %v4679_v10, %v4130_v6  ;;  %v4053_v20 = vor.u32 %v4659_v17, %v4050_v62  ;;  %v4707_v10 = vld [vmem:[#allocation5 + $0x3cc] sm:$0xf]  ;;  %v4242_v6 = vld [vmem:[#allocation5 + $0x3d8] sm:$0xf0] }
 0x150   :  { %2590 = vmatpush.bf16.msra.mxu1 %v3893_v19  ;;  %v1611_v2 = vpop.f32.mrf.mxu0  ;;  %v4697_v19 = vld [vmem:[#allocation5 + $0x374] sm:$0xf0] }
 0x151   :  { %2500 = vmatmul.bf16.vlgmr.msra.gmra.mxu2 %v5004_v61  ;;  %v4193_v21 = vor.u32 %v4697_v19, %v4192_v18  ;;  %v4719_v18 = vld [vmem:[%s5148_s5 + $0x28] sm:$0xff] }
 0x152   :  { %2577 = vmatpush.bf16.msra.mxu3 %v3765_v34  ;;  %2548 = vmatpush.bf16.msrb.mxu2 %v4065_v26  ;;  %v4693_v26 = vld [vmem:[#allocation5 + $0x354] sm:$0xf0] }
 0x153   :  { %2591 = vmatmul.bf16.vlgmr.msra.gmra.mxu1 %v4980_v7  ;;  %v4653_v7 = vld [vmem:[#allocation5 + $0x214] sm:$0xf0]  ;;  %v4177_v38 = vor.u32 %v4693_v26, %v4176_v24  ;;  %v4716_v26 = vld [vmem:[%s5148_s5 + $0x10] sm:$0xff] }
 0x154   :  { %v1574_v36 = vpop.f32.mrf.mxu1  ;;  %v4017_v47 = vor.u32 %v4653_v7, %v4016_v43  ;;  %v4258_v43 = vld [vmem:[#allocation5 + $0x3f8] sm:$0xf0] }
 0x155   :  { %2578 = vmatmul.bf16.vlgmr.msra.gmra.mxu3 %v4973_v51  ;;  %v4661_v51 = vld [vmem:[#allocation5 + $0x254] sm:$0xf0]  ;;  %v4161_v36 = vor.u32 %v4689_v32, %v4160_v29  ;;  %v1769_v32 = vperm.slane %v5022_v57, 3 }
 0x156   :  { %v4049_v31 = vor.u32 %v4661_v51, %v4048_v27  ;;  %v4037_v51 = vor.u32 %v4655_v22, %v4034_v23  ;;  %2890 = vmatpush.bf16.msrb.mxu3 %v4721_v14  ;;  %v4717_v22 = vld [vmem:[%s5148_s5 + $0x18] sm:$0xff] }
 0x157   :  { %v4729_v23 = vld [vmem:[%s5148_s5 + $0x78] sm:$0xff] }
 0x158   :  { %v1585_v39 = vpop.f32.mrf.mxu3  ;;  %2549 = vmatpush.bf16.msrb.mxu2 %v4049_v31  ;;  %v1613_v28 = vpop.f32.mrf.mxu0  ;;  %v4018_v31 = vld [vmem:[#allocation5 + $0x218] sm:$0xf0]  ;;  %2903 = vmatpush.bf16.msrb.mxu1 %v4729_v23 }
 0x159   :  { %v1586_v40 = vadd.f32 %v1585_v39, %v1573_v33  ;;  %v1598_v41 = vpop.f32.mrf.mxu2  ;;  %v4144_v39 = vld [vmem:[#allocation5 + $0x308] sm:$0xf]  ;;  %v4245_v28 = vor.u32 %v4707_v10, %v4242_v6 }
 0x15a   :  { %v4723_v10 = vld [vmem:[%s5148_s5 + $0x48] sm:$0xff] }
 0x15b   :  { %v1599_v16 = vadd.f32 %v1598_v41, %v1586_v40  ;;  %v4685_v40 = vld [vmem:[#allocation5 + $0x314] sm:$0xf0]  ;;  %v4735_v6 = vld [vmem:[%s5148_s5 + $0xa8] sm:$0xff] }
 0x15c   :  { %2550 = vmatpush.bf16.msrb.mxu2 %v4033_v42  ;;  %v1624_v49 = vpop.f32.mrf.mxu1  ;;  %v4711_v42 = vld [vmem:[#allocation5 + $0x3ec] sm:$0xf]  ;;  %v4145_v7 = vor.u32 %v4685_v40, %v4144_v39 }
 0x15d   :  { %v1612_v44 = vadd.f32 %v1611_v2, %v1599_v16  ;;  %v4651_v2 = vld [vmem:[#allocation5 + $0x20c] sm:$0xf]  ;;  %v4261_v16 = vor.u32 %v4711_v42, %v4258_v43  ;;  %v4736_v42 = vld [vmem:[%s5148_s5 + $0xb0] sm:$0xff] }
 0x15e   :  { %v4021_v33 = vor.u32 %v4651_v2, %v4018_v31  ;;  %v4714_v2 = vld [vmem:[%s5148_s5] sm:$0xff] }
 0x15f   :  { %v1625_v52 = vadd.f32 %v1624_v49, %v1612_v44  ;;  %v4703_v44 = vld [vmem:[#allocation5 + $0x3ac] sm:$0xf]  ;;  %v4726_v31 = vld [vmem:[%s5148_s5 + $0x60] sm:$0xff] }
 0x160   :  { %v1587_v53 = vpop.f32.mrf.mxu3  ;;  %2551 = vmatpush.bf16.msrb.mxu2 %v4017_v47  ;;  %v4226_v47 = vld [vmem:[#allocation5 + $0x3b8] sm:$0xf0]  ;;  %v4699_v49 = vld [vmem:[#allocation5 + $0x38c] sm:$0xf] }
 0x161   :  { %v1600_v30 = vpop.f32.mrf.mxu2  ;;  %v1631_v56 = vmax.f32 %v1625_v52, 0.0  ;;  %v1766_v52 = vperm.slane %v5022_v57, 0  ;;  %v4695_v53 = vld [vmem:[#allocation5 + $0x36c] sm:$0xf] }
 0x162   :  { %v4197_v54 = vor.u32 %v4695_v53, %v4194_v25  ;;  %v4731_v53 = vld [vmem:[%s5148_s5 + $0x88] sm:$0xff] }
 0x163   :  { %v5012_v34 = vpack.c.bf16 %v1631_v56, %v1631_v56  ;;  %2552 = vmatmul.bf16.vlgmr.msrb.gmra.mxu2 %v5004_v61  ;;  %v4691_v56 = vld [vmem:[#allocation5 + $0x34c] sm:$0xf] }
 0x164   :  { %2596 = vmatpush.bf16.msra.mxu2 %v4133_v48  ;;  %v1626_v3 = vpop.f32.mrf.mxu1  ;;  %v4229_v48 = vor.u32 %v4703_v44, %v4226_v47  ;;  %v4722_v44 = vld [vmem:[%s5148_s5 + $0x40] sm:$0xff] }
 0x165   :  { %2461 = vmatmul.bf16.vlgmr.msrb.gmra.mxu0 %v5012_v34  ;;  %v4734_v47 = vld [vmem:[%s5148_s5 + $0xa0] sm:$0xff] }
 0x166   :  { %2557 = vmatpush.bf16.msrb.mxu0 %v4257_v58 }
 0x168   :  { %2597 = vmatpush.bf16.msra.mxu2 %v4117_v35  ;;  %v4178_v35 = vld [vmem:[#allocation5 + $0x358] sm:$0xf0] }
 0x169   :  { %v4181_v63 = vor.u32 %v4691_v56, %v4178_v35  ;;  %v4730_v56 = vld [vmem:[%s5148_s5 + $0x80] sm:$0xff]  ;;  %v4745_v35 = vld [vmem:[%s5148_s5 + $0xf8] sm:$0xff] }
 0x16a   :  { %2558 = vmatpush.bf16.msrb.mxu0 %v4241_v4  ;;  %v4683_v4 = vld [vmem:[#allocation5 + $0x30c] sm:$0xf] }
 0x16b   :  { %v4149_v8 = vor.u32 %v4683_v4, %v4146_v5 }
 0x16c   :  { %2598 = vmatpush.bf16.msra.mxu2 %v4101_v1  ;;  %v4162_v1 = vld [vmem:[#allocation5 + $0x338] sm:$0xf0] }
 0x16d   :  { %v4165_v3 = vor.u32 %v4687_v0, %v4162_v1  ;;  %v4743_v0 = vld [vmem:[%s5148_s5 + $0xe8] sm:$0xff] }
 0x16e   :  { %2559 = vmatpush.bf16.msrb.mxu0 %v4225_v11 }
 0x170   :  { %2599 = vmatpush.bf16.msra.mxu2 %v4085_v9  ;;  %v1767_v9 = vperm.slane %v5022_v57, 1 }
 0x172   :  { %2560 = vmatpush.bf16.msrb.mxu0 %v4209_v45  ;;  %v4720_v45 = vld [vmem:[%s5148_s5 + $0x30] sm:$0xff] }
 0x173   :  { %2891 = vmatpush.bf16.msrb.mxu3 %v4720_v45 }
 0x174   :  { %2600 = vmatpush.bf16.msra.mxu2 %v4069_v55  ;;  %v1768_v55 = vperm.slane %v5022_v57, 2  ;;  %v4732_v57 = vld [vmem:[%s5148_s5 + $0x90] sm:$0xff] }
 0x175   :  { %2513 = vmatmul.bf16.vlgmr.msra.gmra.mxu0 %v5012_v34 }
 0x176   :  { %2561 = vmatpush.bf16.msrb.mxu0 %v4193_v21 }
 0x177   :  { %2892 = vmatpush.bf16.msrb.mxu3 %v4719_v18 }
 0x178   :  { %v2423_v27 = vpop.f32.mrf.mxu3  ;;  %2601 = vmatpush.bf16.msra.mxu2 %v4053_v20  ;;  %v4718_v20 = vld [vmem:[%s5148_s5 + $0x20] sm:$0xff] }
 0x179   :  { %v2424_v30 = vadd.f32 %v2423_v27, %v1766_v52  ;;  %v4728_v27 = vld [vmem:[%s5148_s5 + $0x70] sm:$0xff] }
 0x17a   :  { %2562 = vmatpush.bf16.msrb.mxu0 %v4177_v38  ;;  %2904 = vmatpush.bf16.msrb.mxu1 %v4728_v27  ;;  %v4727_v38 = vld [vmem:[%s5148_s5 + $0x68] sm:$0xff] }
 0x17b   :  { %2893 = vmatpush.bf16.msrb.mxu3 %v4718_v20 }
 0x17c   :  { %2602 = vmatpush.bf16.msra.mxu2 %v4037_v51  ;;  %v4715_v51 = vld [vmem:[%s5148_s5 + $0x8] sm:$0xff] }
 0x17e   :  { %2563 = vmatpush.bf16.msrb.mxu0 %v4161_v36  ;;  %2905 = vmatpush.bf16.msrb.mxu1 %v4727_v38  ;;  %v4737_v36 = vld [vmem:[%s5148_s5 + $0xb8] sm:$0xff] }
 0x17f   :  { %2894 = vmatpush.bf16.msrb.mxu3 %v4717_v22 }
 0x180   :  { %v2425_v41 = vpop.f32.mrf.mxu3  ;;  %2603 = vmatpush.bf16.msra.mxu2 %v4021_v33  ;;  %v4725_v33 = vld [vmem:[%s5148_s5 + $0x58] sm:$0xff] }
 0x181   :  { %v4724_v41 = vld [vmem:[%s5148_s5 + $0x50] sm:$0xff] }
 0x182   :  { %2564 = vmatpush.bf16.msrb.mxu0 %v4145_v7  ;;  %2906 = vmatpush.bf16.msrb.mxu1 %v4726_v31 }
 0x183   :  { %2604 = vmatmul.bf16.vlgmr.msra.gmra.mxu2 %v5004_v61  ;;  %v4213_v61 = vor.u32 %v4699_v49, %v4210_v50  ;;  %2895 = vmatpush.bf16.msrb.mxu3 %v4716_v26  ;;  %v4733_v50 = vld [vmem:[%s5148_s5 + $0x98] sm:$0xff] }
 0x184   :  { %2916 = vmatpush.bf16.msrb.mxu2 %v4737_v36 }
 0x185   :  { %2565 = vmatmul.bf16.vlgmr.msrb.gmra.mxu0 %v5012_v34 }
 0x186   :  { %2609 = vmatpush.bf16.msra.mxu0 %v4261_v16  ;;  %2907 = vmatpush.bf16.msrb.mxu1 %v4725_v33 }
 0x187   :  { %2896 = vmatpush.bf16.msrb.mxu3 %v4715_v51 }
 0x188   :  { %v2436_v58 = vpop.f32.mrf.mxu1  ;;  %2917 = vmatpush.bf16.msrb.mxu2 %v4736_v42 }
 0x189   :  { %v5025_v60 = vadd.f32 %v2436_v58, %v2424_v30 }
 0x18a   :  { %2610 = vmatpush.bf16.msra.mxu0 %v4245_v28  ;;  %2908 = vmatpush.bf16.msrb.mxu1 %v4724_v41 }
 0x18b   :  { %2897 = vmatpush.bf16.msrb.mxu3 %v4714_v2 }
 0x18c   :  { %2918 = vmatpush.bf16.msrb.mxu2 %v4735_v6 }
 0x18e   :  { %2611 = vmatpush.bf16.msra.mxu0 %v4229_v48  ;;  %2909 = vmatpush.bf16.msrb.mxu1 %v4723_v10 }
 0x190   :  { %v2438_v46 = vpop.f32.mrf.mxu1  ;;  %2919 = vmatpush.bf16.msrb.mxu2 %v4734_v47 }
 0x192   :  { %2612 = vmatpush.bf16.msra.mxu0 %v4213_v61  ;;  %2910 = vmatpush.bf16.msrb.mxu1 %v4722_v44 }
 0x194   :  { %2920 = vmatpush.bf16.msrb.mxu2 %v4733_v50 }
 0x196   :  { %2613 = vmatpush.bf16.msra.mxu0 %v4197_v54 }
 0x198   :  { %v2475_v59 = vpop.f32.mrf.mxu3  ;;  %v2488_v12 = vpop.f32.mrf.mxu1  ;;  %2921 = vmatpush.bf16.msrb.mxu2 %v4732_v57 }
 0x199   :  { %v2476_v11 = vadd.f32 %v2475_v59, %v1767_v9 }
 0x19a   :  { %2614 = vmatpush.bf16.msra.mxu0 %v4181_v63 }
 0x19b   :  { %v5028_v13 = vadd.f32 %v2488_v12, %v2476_v11  ;;  %v4740_v11 = vld [vmem:[%s5148_s5 + $0xd0] sm:$0xff] }
 0x19c   :  { %2922 = vmatpush.bf16.msrb.mxu2 %v4731_v53 }
 0x19e   :  { %2615 = vmatpush.bf16.msra.mxu0 %v4165_v3  ;;  %v4742_v3 = vld [vmem:[%s5148_s5 + $0xe0] sm:$0xff] }
 0x1a0   :  { %v2477_v37 = vpop.f32.mrf.mxu3  ;;  %v2490_v15 = vpop.f32.mrf.mxu1  ;;  %2923 = vmatpush.bf16.msrb.mxu2 %v4730_v56 }
 0x1a1   :  { %v4741_v37 = vld [vmem:[%s5148_s5 + $0xd8] sm:$0xff]  ;;  %v4738_v15 = vld [vmem:[%s5148_s5 + $0xc0] sm:$0xff] }
 0x1a2   :  { %2616 = vmatpush.bf16.msra.mxu0 %v4149_v8 }
 0x1a5   :  { %2617 = vmatmul.bf16.vlgmr.msra.gmra.mxu0 %v5012_v34 }
 0x1a6   :  { %2929 = vmatpush.bf16.msrb.mxu0 %v4745_v35 }
 0x1b0   :  { %v2540_v34 = vpop.f32.mrf.mxu1 }
 0x1b8   :  { %v2527_v17 = vpop.f32.mrf.mxu3  ;;  %v2542_v24 = vpop.f32.mrf.mxu1 }
 0x1b9   :  { %v2528_v62 = vadd.f32 %v2527_v17, %v1768_v55 }
 0x1bb   :  { %v5041_v19 = vadd.f32 %v2540_v34, %v2528_v62 }
 0x1c0   :  { %v2529_v21 = vpop.f32.mrf.mxu3 }
 0x1c4   :  { %v2449_v29 = vpop.f32.mrf.mxu2 }
 0x1c5   :  { %v2450_v52 = vadd.f32 %v2449_v29, %v5025_v60  ;;  %v4744_v60 = vld [vmem:[%s5148_s5 + $0xf0] sm:$0xff] }
 0x1c6   :  { %2930 = vmatpush.bf16.msrb.mxu0 %v4744_v60 }
 0x1ca   :  { %2931 = vmatpush.bf16.msrb.mxu0 %v4743_v0 }
 0x1cc   :  { %v2451_v7 = vpop.f32.mrf.mxu2 }
 0x1ce   :  { %2932 = vmatpush.bf16.msrb.mxu0 %v4742_v3 }
 0x1d0   :  { %v2592_v43 = vpop.f32.mrf.mxu1 }
 0x1d2   :  { %2933 = vmatpush.bf16.msrb.mxu0 %v4741_v37 }
 0x1d4   :  { %v2501_v49 = vpop.f32.mrf.mxu2 }
 0x1d5   :  { %v2502_v4 = vadd.f32 %v2501_v49, %v5028_v13  ;;  %v4739_v13 = vld [vmem:[%s5148_s5 + $0xc8] sm:$0xff] }
 0x1d6   :  { %2934 = vmatpush.bf16.msrb.mxu0 %v4740_v11 }
 0x1d8   :  { %v2579_v39 = vpop.f32.mrf.mxu3  ;;  %v2594_v48 = vpop.f32.mrf.mxu1 }
 0x1d9   :  { %v2580_v40 = vadd.f32 %v2579_v39, %v1769_v32  ;;  %v4751_v32 = vld [vmem:[%s5149_s6] ss:$0 sm:$0xff] }
 0x1da   :  { %2935 = vmatpush.bf16.msrb.mxu0 %v4739_v13 }
 0x1db   :  { %v5083_v16 = vadd.f32 %v2592_v43, %v2580_v40 }
 0x1dc   :  { %v2503_v61 = vpop.f32.mrf.mxu2 }
 0x1de   :  { %2936 = vmatpush.bf16.msrb.mxu0 %v4738_v15 }
 0x1e0   :  { %v2581_v28 = vpop.f32.mrf.mxu3 }
 0x1e2   :  { %v2462_v25 = vpop.f32.mrf.mxu0 }
 0x1e3   :  { %v2463_v54 = vadd.f32 %v2462_v25, %v2450_v52 }
 0x1e5   :  { %v2622_v30 = vmax.f32 %v2463_v54, 0.0 }
 0x1e6   :  { %v2553_v58 = vpop.f32.mrf.mxu2 }
 0x1e7   :  { %v2626_v59 = vpack.c.bf16 %v2622_v30, %v2622_v30  ;;  %v2554_v14 = vadd.f32 %v2553_v58, %v5041_v19 }
 0x1e9   :  { %2898 = vmatmul.bf16.vlgmr.msrb.gmra.mxu3 %v2626_v59 }
 0x1ea   :  { %v2464_v63 = vpop.f32.mrf.mxu0 }
 0x1ee   :  { %v2555_v1 = vpop.f32.mrf.mxu2 }
 0x1f2   :  { %v2514_v5 = vpop.f32.mrf.mxu0 }
 0x1f3   :  { %v2515_v46 = vadd.f32 %v2514_v5, %v2502_v4 }
 0x1f5   :  { %v2623_v8 = vmax.f32 %v2515_v46, 0.0 }
 0x1f7   :  { %v2627_v9 = vpack.c.bf16 %v2623_v8, %v2623_v8 }
 0x1f9   :  { %2911 = vmatmul.bf16.vlgmr.msrb.gmra.mxu1 %v2627_v9 }
 0x1fa   :  { %v2516_v12 = vpop.f32.mrf.mxu0 }
 0x202   :  { %v2566_v55 = vpop.f32.mrf.mxu0 }
 0x203   :  { %v2567_v45 = vadd.f32 %v2566_v55, %v2554_v14 }
 0x205   :  { %v2624_v62 = vmax.f32 %v2567_v45, 0.0 }
 0x206   :  { %v2605_v17 = vpop.f32.mrf.mxu2 }
 0x207   :  { %v2628_v18 = vpack.c.bf16 %v2624_v62, %v2624_v62  ;;  %v2606_v21 = vadd.f32 %v2605_v17, %v5083_v16 }
 0x209   :  { %2924 = vmatmul.bf16.vlgmr.msrb.gmra.mxu2 %v2628_v18 }
 0x20a   :  { %v2568_v34 = vpop.f32.mrf.mxu0 }
 0x20e   :  { %v2607_v20 = vpop.f32.mrf.mxu2 }
 0x222   :  { %v2618_v22 = vpop.f32.mrf.mxu0 }
 0x223   :  { %v2619_v23 = vadd.f32 %v2618_v22, %v2606_v21 }
 0x225   :  { %v2625_v24 = vmax.f32 %v2619_v23, 0.0 }
 0x227   :  { %v2629_v26 = vpack.c.bf16 %v2625_v24, %v2625_v24 }
 0x229   :  { %2937 = vmatmul.bf16.vlgmr.msrb.gmra.mxu0 %v2629_v26 }
 0x22a   :  { %v2620_v19 = vpop.f32.mrf.mxu0 }
 0x26c   :  { %v2899_v27 = vpop.f32.mrf.mxu3 }
 0x26d   :  { %v2900_v33 = vadd.f32 %v4751_v32, %v2899_v27 }
 0x274   :  { %v2901_v51 = vpop.f32.mrf.mxu3 }
 0x276   :  { %v2912_v38 = vpop.f32.mrf.mxu1 }
 0x277   :  { %v2913_v36 = vadd.f32 %v2912_v38, %v2900_v33 }
 0x27e   :  { %v2914_v2 = vpop.f32.mrf.mxu1 }
 0x28c   :  { %v2925_v31 = vpop.f32.mrf.mxu2 }
 0x28d   :  { %v2926_v39 = vadd.f32 %v2925_v31, %v2913_v36 }
 0x294   :  { %v2927_v29 = vpop.f32.mrf.mxu2 }
 0x2a6   :  { %v2938_v40 = vpop.f32.mrf.mxu0 }
 0x2a7   :  { %v2939_v41 = vadd.f32 %v2938_v40, %v2926_v39 }
 0x2a9   :  { %2943 = vst.msk [vmem:[#allocation7] sm:$0xff] %vm2942_vm1, %v2939_v41 }
 0x2aa   :  { %2954 = dma.vmem_to_hbm [thread:$0]  %s2950_s1, 128, %s2952_s14, [#allocation4]  }
 0x2ae   :  { %v2940_v42 = vpop.f32.mrf.mxu0 }
 0x2af   :  { %4828 = dma.done.wait [#allocation4], 128  }
 0x2b0   :  { %4829 = vsyncadd [#allocation4], 4294967168 }
 0x2b1   :  { %2959 = vsyncpa [#allocation3], 1 }
 0x2b2   :  { %2960 = vsyncpa [#allocation6], 1 }
 0x2b3   :  { %2961 = vsyncpa [#allocation4], 1 }

</bundles_post_ra>
